<compile_context>
chip_gen: v7x
topology: tpu7x:2x2x1
jax: 0.10.0
libtpu: 0.0.40
codegen_flags: <defaults>
</compile_context>

<pallas_src>
import jax
import jax.numpy as jnp
import numpy as np
from jax.experimental import pallas as pl
from jax.experimental.pallas import tpu as pltpu


def _round_up(x, m):
    return ((x + m - 1) // m) * m


def _time_chunk(T, cap=16):
    """Largest divisor of T that is <= cap (amortizes per-grid-step overhead)."""
    ts = 1
    for d in range(1, min(cap, T) + 1):
        if T % d == 0:
            ts = d
    return ts
    # TODO(synk): for prime T this degrades to ts=1 (correct but one grid step per
    # timestep); padding T with guarded state updates would avoid the cliff.


def _vmem_limit_bytes():
    """Per-generation VMEM limit (~75% of capacity), clamped, with a safe fallback."""
    cap = None
    try:
        cap = int(pltpu.get_tpu_info().vmem_capacity_bytes)
    except Exception:
        cap = None
    if not cap or cap <= 0:
        cap = 64 * 1024 * 1024
    return int(min(max(cap * 3 // 4, 32 * 1024 * 1024), 100 * 1024 * 1024))


_VMEM_LIMIT = _vmem_limit_bytes()
# 256 rows fills the 2x256x256 MXU on v6e (128 MiB VMEM); stay at 128 on v7x (64 MiB).
_MOS_ROW_TILE = 256 if _VMEM_LIMIT >= 80 * 1024 * 1024 else 128


# ----------------------------------------------------------------------------
# Pallas kernel 1: one LSTM layer.
# Grid iterates sequentially over chunks of timesteps; h/c carried in VMEM scratch.
# The input projection (x @ W_ih^T) is precomputed outside as one big matmul (bf16),
# so the per-step critical path is only the recurrent h @ W_hh^T (bf16, f32 acc).
# W_hh lives in HBM (pl.ANY) and is copied once into a single VMEM scratch buffer.
# ----------------------------------------------------------------------------
def _lstm_layer_kernel(xp_ref, b_ref, whh_hbm, y_ref, hT_ref, cT_ref,
                       h_sc, c_sc, w_sc):
    t = pl.program_id(0)
    ts = xp_ref.shape[0]
    Hp = h_sc.shape[-1]

    @pl.when(t == 0)
    def _():
        # Single-buffered constant weight: one DMA for the whole (sequential) grid.
        pltpu.sync_copy(whh_hbm, w_sc)
        h_sc[...] = jnp.zeros_like(h_sc)
        c_sc[...] = jnp.zeros_like(c_sc)

    w = w_sc[...]                        # (Hp, 4Hp) bf16, hoisted out of the time loop
    b = b_ref[...]                       # (1, 4Hp) f32

    def step(s, carry):
        h_prev, c_prev = carry
        gates = (xp_ref[s].astype(jnp.float32) + b
                 + jnp.dot(h_prev.astype(w.dtype), w,
                           preferred_element_type=jnp.float32))      # (Bp, 4Hp) f32
        # PyTorch gate order: i, f, g, o.  Hp % 128 == 0 -> each slice is lane-aligned.
        i_g = jax.nn.sigmoid(gates[:, 0 * Hp:1 * Hp])
        f_g = jax.nn.sigmoid(gates[:, 1 * Hp:2 * Hp])
        g_g = jnp.tanh(gates[:, 2 * Hp:3 * Hp])
        o_g = jax.nn.sigmoid(gates[:, 3 * Hp:4 * Hp])
        c_new = f_g * c_prev + i_g * g_g
        h_new = o_g * jnp.tanh(c_new)
        y_ref[s] = h_new
        return h_new, c_new

    h, c = jax.lax.fori_loop(0, ts, step, (h_sc[...], c_sc[...]), unroll=True)
    h_sc[...] = h
    c_sc[...] = c

    @pl.when(t == pl.num_programs(0) - 1)
    def _():
        hT_ref[...] = h
        cT_ref[...] = c


def lstm_layer(x, w_ih, w_hh, b_ih, b_hh):
    """x: (T, B, Din) f32. Returns (ys (T,B,H), h_T (B,H), c_T (B,H))."""
    T, B, Din = x.shape
    H = w_hh.shape[1]
    Hp = _round_up(H, 128)       # lane-aligned gate slices
    Bp = _round_up(B, 8)         # full sublanes in the (B, 4H) gate tile
    ts = _time_chunk(T)
    nchunks = T // ts

    # Pad each gate block to Hp with zeros (padded h/c columns provably stay 0:
    # gate preact 0 -> i*g = 0, f = 0.5 keeps c_pad = 0, h_pad = 0.5*tanh(0) = 0).
    w_ih4 = jnp.zeros((4, Hp, Din), jnp.float32).at[:, :H, :].set(w_ih.reshape(4, H, Din))
    w_hh4 = jnp.zeros((4, Hp, Hp), jnp.float32).at[:, :H, :H].set(w_hh.reshape(4, H, H))
    b4 = jnp.zeros((4, Hp), jnp.float32).at[:, :H].set((b_ih + b_hh).reshape(4, H))
    wih_t = w_ih4.reshape(4 * Hp, Din).T.astype(jnp.bfloat16)       # (Din, 4Hp)
    whh_t = w_hh4.reshape(4 * Hp, Hp).T.astype(jnp.bfloat16)        # (Hp, 4Hp)
    b = b4.reshape(1, 4 * Hp)                                       # (1, 4Hp) f32

    # Hoisted input projection: one (T*Bp)-row MXU matmul; stored bf16 (halves its
    # HBM<->VMEM traffic), bias is added in-kernel in f32.
    x_p = jnp.zeros((T, Bp, Din), jnp.float32).at[:, :B, :].set(x)
    xp = jnp.dot(x_p.reshape(T * Bp, Din).astype(jnp.bfloat16), wih_t,
                 preferred_element_type=jnp.float32)
    xp = xp.astype(jnp.bfloat16).reshape(T, Bp, 4 * Hp)

    ys, hT, cT = pl.pallas_call(
        _lstm_layer_kernel,
        out_shape=(jax.ShapeDtypeStruct((T, Bp, Hp), jnp.float32),
                   jax.ShapeDtypeStruct((Bp, Hp), jnp.float32),
                   jax.ShapeDtypeStruct((Bp, Hp), jnp.float32)),
        grid_spec=pltpu.PrefetchScalarGridSpec(
            num_scalar_prefetch=0,
            grid=(nchunks,),
            in_specs=[pl.BlockSpec((ts, Bp, 4 * Hp), lambda t: (t, 0, 0)),
                      pl.BlockSpec((1, 4 * Hp), lambda t: (0, 0)),
                      pl.BlockSpec(memory_space=pl.ANY)],   # W_hh: HBM, single copy
            out_specs=(pl.BlockSpec((ts, Bp, Hp), lambda t: (t, 0, 0)),
                       pl.BlockSpec((Bp, Hp), lambda t: (0, 0)),
                       pl.BlockSpec((Bp, Hp), lambda t: (0, 0))),
            scratch_shapes=[pltpu.VMEM((Bp, Hp), jnp.float32),
                            pltpu.VMEM((Bp, Hp), jnp.float32),
                            pltpu.VMEM((Hp, 4 * Hp), jnp.bfloat16)]),
        compiler_params=pltpu.CompilerParams(
            dimension_semantics=("arbitrary",),
            vmem_limit_bytes=_VMEM_LIMIT),
    )(xp, b, whh_t)
    # TODO(synk): on v7x, add a leading "parallel" grid axis over a batch shard so the
    # second TensorCore carries half the recurrence (pays off once B >= 16; B=2 here).
    return ys[:, :B, :H], hT[:B, :H], cT[:B, :H]


# ----------------------------------------------------------------------------
# Pallas kernel 2: Mixture-of-Softmaxes head, expert-streamed.
#   latent_e = tanh(h @ Wlat_e^T + blat_e); logit_e = latent_e @ Wdec^T + bdec
#   prob     = sum_e prior[:, e] * softmax(logit_e);  out = log(prob + 1e-8)
# Grid = (row tiles [parallel], experts [arbitrary]).  One expert's latent weights are
# streamed per step; probabilities accumulate directly into the VMEM-resident out_ref
# (no accumulator scratch); the prior weight is fused into the softmax normalization.
# ----------------------------------------------------------------------------
def _mos_head_kernel(h_ref, prior_ref, lat_w_ref, lat_b_ref, dec_w_ref, dec_b_ref,
                     out_ref):
    e = pl.program_id(1)
    n_exp = pl.num_programs(1)

    h = h_ref[...]                                                     # (tn, Hl) bf16
    lat = jnp.tanh(jnp.dot(h, lat_w_ref[0],
                           preferred_element_type=jnp.float32)
                   + lat_b_ref[0])                                     # (tn, ninp) f32
    logit = (jnp.dot(lat.astype(dec_w_ref.dtype), dec_w_ref[...],
                     preferred_element_type=jnp.float32)
             + dec_b_ref[...])                                         # (tn, Vp) f32

    # Softmax fused with this expert's prior weight (padded vocab cols -> exp() == 0).
    m = jnp.max(logit, axis=-1, keepdims=True)
    ex = jnp.exp(logit - m)
    denom = jnp.sum(ex, axis=-1, keepdims=True)
    p_e = prior_ref[0]                                                 # (tn, 1) f32
    contrib = (p_e * pl.reciprocal(denom, approx=False)) * ex

    @pl.when(e == 0)
    def _():
        out_ref[...] = contrib

    @pl.when(e > 0)
    def _():
        out_ref[...] = out_ref[...] + contrib

    @pl.when(e == n_exp - 1)
    def _():
        out_ref[...] = jnp.log(out_ref[...] + 1e-8)


def mos_head(h_flat, prior_w, lat_w, lat_b, dec_w, dec_b,
             n_experts, ninp, ntoken, row_tile=None):
    """h_flat: (N, nhidlast) f32 -> log-prob (N, ntoken) f32."""
    N, Hl = h_flat.shape
    row_tile = row_tile or _MOS_ROW_TILE
    n_pad = _round_up(N, row_tile)
    ntok_pad = _round_up(ntoken, 128)            # lane-dense vocab / output stores

    h_pad = jnp.zeros((n_pad, Hl), jnp.float32).at[:N].set(h_flat).astype(jnp.bfloat16)

    # Prior softmax is negligible work -> precompute in XLA, feed per-expert columns.
    prior = jax.nn.softmax(h_flat @ prior_w.T, axis=-1)                 # (N, E) f32
    prior_cols = jnp.zeros((n_experts, n_pad, 1), jnp.float32).at[:, :N, 0].set(prior.T)

    lat_w_t = (lat_w.reshape(n_experts, ninp, Hl)
               .transpose(0, 2, 1).astype(jnp.bfloat16))                # (E, Hl, ninp)
    lat_b3 = lat_b.reshape(n_experts, 1, ninp).astype(jnp.float32)      # (E, 1, ninp)

    # Padded vocab columns get zero weights and a -1e30 bias so exp() underflows to 0.
    dec_w_t = jnp.zeros((ninp, ntok_pad), jnp.bfloat16).at[:, :ntoken].set(
        dec_w.T.astype(jnp.bfloat16))                                   # (ninp, Vp)
    dec_b2 = jnp.full((1, ntok_pad), -1e30, jnp.float32).at[0, :ntoken].set(
        dec_b.astype(jnp.float32))                                      # (1, Vp)

    out_pad = pl.pallas_call(
        _mos_head_kernel,
        out_shape=jax.ShapeDtypeStruct((n_pad, ntok_pad), jnp.float32),
        grid_spec=pltpu.PrefetchScalarGridSpec(
            num_scalar_prefetch=0,
            grid=(n_pad // row_tile, n_experts),
            in_specs=[
                pl.BlockSpec((row_tile, Hl), lambda i, e: (i, 0)),
                pl.BlockSpec((1, row_tile, 1), lambda i, e: (e, i, 0)),
                pl.BlockSpec((1, Hl, ninp), lambda i, e: (e, 0, 0)),
                pl.BlockSpec((1, 1, ninp), lambda i, e: (e, 0, 0)),
                # TODO(synk): dec_w/dec_b have constant block indices (fetched once but
                # still double-buffered); a manual single-buffer copy is not megacore-
                # safe with the "parallel" row axis, so the simple blocked spec stays.
                pl.BlockSpec((ninp, ntok_pad), lambda i, e: (0, 0)),
                pl.BlockSpec((1, ntok_pad), lambda i, e: (0, 0)),
            ],
            out_specs=pl.BlockSpec((row_tile, ntok_pad), lambda i, e: (i, 0))),
        compiler_params=pltpu.CompilerParams(
            dimension_semantics=("parallel", "arbitrary"),
            vmem_limit_bytes=_VMEM_LIMIT),
    )(h_pad, prior_cols, lat_w_t, lat_b3, dec_w_t, dec_b2)
    return out_pad[:N, :ntoken]


# ----------------------------------------------------------------------------
# Parameter construction (deterministic, mirrors nn.Module __init__ shapes)
# ----------------------------------------------------------------------------
def init_params(key, ntoken, ninp, nhid, nhidlast, nlayers, n_experts):
    ks = list(jax.random.split(key, 4 + 4 * nlayers))
    p = {}
    enc = jax.random.uniform(ks[0], (ntoken, ninp), jnp.float32, -0.1, 0.1)
    p["encoder"] = enc.at[0, :].set(0.0)

    p["lstm"] = []
    for l in range(nlayers):
        din = ninp if l == 0 else nhid
        h = nhid if l != nlayers - 1 else nhidlast
        k = 1.0 / np.sqrt(h)
        kk = jax.random.split(ks[1 + l], 4)
        p["lstm"].append(dict(
            w_ih=jax.random.uniform(kk[0], (4 * h, din), jnp.float32, -k, k),
            w_hh=jax.random.uniform(kk[1], (4 * h, h), jnp.float32, -k, k),
            b_ih=jax.random.uniform(kk[2], (4 * h,), jnp.float32, -k, k),
            b_hh=jax.random.uniform(kk[3], (4 * h,), jnp.float32, -k, k)))

    p["prior_w"] = jax.random.uniform(ks[-3], (n_experts, nhidlast),
                                      jnp.float32, -0.1, 0.1)
    p["lat_w"] = jax.random.uniform(ks[-2], (n_experts * ninp, nhidlast),
                                    jnp.float32, -0.1, 0.1)
    p["lat_b"] = jnp.zeros((n_experts * ninp,), jnp.float32)
    p["dec_w"] = jax.random.uniform(ks[-1], (ntoken, ninp), jnp.float32, -0.1, 0.1)
    p["dec_b"] = jnp.zeros((ntoken,), jnp.float32)          # init_weights: bias = 0
    return p


# ----------------------------------------------------------------------------
# Forward (matches RNNModel.forward, eval mode, zero initial hidden)
# ----------------------------------------------------------------------------
def rnn_model_forward(params, tokens, ninp, ntoken, n_experts):
    T, B = tokens.shape
    emb = params["encoder"][tokens]                 # (T, B, ninp) embedding lookup

    raw_output = emb
    new_hidden = []
    for layer in params["lstm"]:
        raw_output, hT, cT = lstm_layer(raw_output, layer["w_ih"], layer["w_hh"],
                                        layer["b_ih"], layer["b_hh"])
        new_hidden.append((hT[None], cT[None]))     # (1, B, H) like PyTorch

    output = raw_output                             # (T, B, nhidlast)
    h_flat = output.reshape(T * B, -1)
    log_prob = mos_head(h_flat, params["prior_w"], params["lat_w"], params["lat_b"],
                        params["dec_w"], params["dec_b"], n_experts, ninp, ntoken)
    model_output = log_prob.reshape(T, B, ntoken)
    return model_output, new_hidden
    # TODO(synk): dropout paths (LockedDropout / embedded_dropout / WeightDrop) are
    # identity in eval mode and therefore intentionally omitted.


# ----------------------------------------------------------------------------
# Pure-JAX reference for correctness check (f32 throughout)
# ----------------------------------------------------------------------------
def _lstm_ref(x, w_ih, w_hh, b_ih, b_hh):
    B = x.shape[1]
    H = w_hh.shape[1]

    def step(carry, xt):
        h, c = carry
        gates = xt @ w_ih.T + h @ w_hh.T + b_ih + b_hh
        i, f, g, o = jnp.split(gates, 4, axis=-1)
        c = jax.nn.sigmoid(f) * c + jax.nn.sigmoid(i) * jnp.tanh(g)
        h = jax.nn.sigmoid(o) * jnp.tanh(c)
        return (h, c), h

    (hT, cT), ys = jax.lax.scan(step, (jnp.zeros((B, H)), jnp.zeros((B, H))), x)
    return ys, hT, cT


def _forward_ref(params, tokens, ninp, ntoken, n_experts):
    T, B = tokens.shape
    x = params["encoder"][tokens]
    for layer in params["lstm"]:
        x, _, _ = _lstm_ref(x, layer["w_ih"], layer["w_hh"],
                            layer["b_ih"], layer["b_hh"])
    out = x.reshape(T * B, -1)
    latent = jnp.tanh(out @ params["lat_w"].T + params["lat_b"])
    logit = latent.reshape(-1, ninp) @ params["dec_w"].T + params["dec_b"]
    prior = jax.nn.softmax(out @ params["prior_w"].T, axis=-1)
    prob = jax.nn.softmax(logit, axis=-1).reshape(-1, n_experts, ntoken)
    prob = (prob * prior[:, :, None]).sum(1)
    return jnp.log(prob + 1e-8).reshape(T, B, ntoken)


if __name__ == "__main__":
    # Small, shape-consistent config
    ntoken, ninp, nhid, nhidlast = 64, 16, 32, 32
    nlayers, n_experts = 2, 4
    seq, batch = 8, 2

    key = jax.random.PRNGKey(0)
    kp, kt = jax.random.split(key)
    params = init_params(kp, ntoken, ninp, nhid, nhidlast, nlayers, n_experts)
    tokens = jax.random.randint(kt, (seq, batch), 0, ntoken, dtype=jnp.int32)

    model_output, hidden = rnn_model_forward(params, tokens, ninp, ntoken, n_experts)
    model_output = jax.block_until_ready(model_output)

    ref = _forward_ref(params, tokens, ninp, ntoken, n_experts)
    # bf16 MXU operands -> relaxed tolerance vs the f32 reference
    np.testing.assert_allclose(np.asarray(model_output), np.asarray(ref),
                               rtol=5e-2, atol=5e-2)
    assert model_output.shape == (seq, batch, ntoken)
    assert hidden[0][0].shape == (1, batch, nhid)
    assert hidden[-1][0].shape == (1, batch, nhidlast)

    print("KERNEL_OK")
</pallas_src>

<mosaic_0001>
module attributes {stable_mosaic.version = 11 : i64} {
  func.func @_lstm_layer_kernel(%arg0: i32, %arg1: memref<8x8x512xbf16, #tpu.memory_space<vmem>>, %arg2: memref<1x512xf32, #tpu.memory_space<vmem>>, %arg3: memref<128x512xbf16, #tpu.memory_space<any>>, %arg4: memref<8x8x128xf32, #tpu.memory_space<vmem>>, %arg5: memref<8x128xf32, #tpu.memory_space<vmem>>, %arg6: memref<8x128xf32, #tpu.memory_space<vmem>>, %arg7: memref<8x128xf32, #tpu.memory_space<vmem>>, %arg8: memref<8x128xf32, #tpu.memory_space<vmem>>, %arg9: memref<128x512xbf16, #tpu.memory_space<vmem>>) attributes {dimension_semantics = [#tpu.dimension_semantics<arbitrary>], iteration_bounds = array<i64: 1>, scalar_prefetch = 0 : i64, scratch_operands = 3 : i64, tpu.core_type = #tpu.core_type<tc>, window_params = [{transform_indices = @transform_0, window_bounds = array<i64: 8, 8, 512>}, {pipeline_mode = #tpu.pipeline_mode<synchronous>, transform_indices = @transform_1, window_bounds = array<i64: 1, 512>}, {}, {transform_indices = @transform_3, window_bounds = array<i64: 8, 8, 128>}, {pipeline_mode = #tpu.pipeline_mode<synchronous>, transform_indices = @transform_4, window_bounds = array<i64: 8, 128>}, {pipeline_mode = #tpu.pipeline_mode<synchronous>, transform_indices = @transform_5, window_bounds = array<i64: 8, 128>}]} {
    %c0_i32 = arith.constant 0 : i32
    %0 = arith.cmpi eq, %arg0, %c0_i32 : i32
    %1 = arith.extui %0 : i1 to i32
    %c0_i32_0 = arith.constant 0 : i32
    %2 = arith.cmpi ne, %1, %c0_i32_0 : i32
    scf.if %2 {
      "tpu.region"() ({
        %320 = tpu.sem_alloc : memref<!tpu.dma_semaphore, #tpu.memory_space<semaphore_mem>>
        tpu.enqueue_dma source(%arg3 : memref<128x512xbf16, #tpu.memory_space<any>>) target(%arg9 : memref<128x512xbf16, #tpu.memory_space<vmem>>) target_semaphore(%320 : memref<!tpu.dma_semaphore, #tpu.memory_space<semaphore_mem>>)
        tpu.wait_dma2 semaphore(%320 : memref<!tpu.dma_semaphore, #tpu.memory_space<semaphore_mem>>) src(%arg3 : memref<128x512xbf16, #tpu.memory_space<any>>) dst(%arg9 : memref<128x512xbf16, #tpu.memory_space<vmem>>)
        tpu.yield
      }) : () -> ()
      %cst_78 = arith.constant 0.000000e+00 : f32
      %316 = vector.broadcast %cst_78 : f32 to vector<8x128xf32>
      %c0_79 = arith.constant 0 : index
      %c0_80 = arith.constant 0 : index
      %317 = vector.load %arg7[%c0_79, %c0_80] : memref<8x128xf32, #tpu.memory_space<vmem>>, vector<8x128xf32>
      tpu.vector_store %arg7[%c0_79, %c0_80], %316 {strides = array<i32>} : memref<8x128xf32, #tpu.memory_space<vmem>>, vector<8x128xf32>,
      %cst_81 = arith.constant 0.000000e+00 : f32
      %318 = vector.broadcast %cst_81 : f32 to vector<8x128xf32>
      %c0_82 = arith.constant 0 : index
      %c0_83 = arith.constant 0 : index
      %319 = vector.load %arg8[%c0_82, %c0_83] : memref<8x128xf32, #tpu.memory_space<vmem>>, vector<8x128xf32>
      tpu.vector_store %arg8[%c0_82, %c0_83], %318 {strides = array<i32>} : memref<8x128xf32, #tpu.memory_space<vmem>>, vector<8x128xf32>,
    } else {
    }
    %c0 = arith.constant 0 : index
    %c0_1 = arith.constant 0 : index
    %3 = vector.load %arg9[%c0, %c0_1] : memref<128x512xbf16, #tpu.memory_space<vmem>>, vector<128x512xbf16>
    %c0_2 = arith.constant 0 : index
    %c0_3 = arith.constant 0 : index
    %4 = vector.load %arg2[%c0_2, %c0_3] : memref<1x512xf32, #tpu.memory_space<vmem>>, vector<1x512xf32>
    %c0_4 = arith.constant 0 : index
    %c0_5 = arith.constant 0 : index
    %5 = vector.load %arg7[%c0_4, %c0_5] : memref<8x128xf32, #tpu.memory_space<vmem>>, vector<8x128xf32>
    %c0_6 = arith.constant 0 : index
    %c0_7 = arith.constant 0 : index
    %6 = vector.load %arg8[%c0_6, %c0_7] : memref<8x128xf32, #tpu.memory_space<vmem>>, vector<8x128xf32>
    %c0_i32_8 = arith.constant 0 : i32
    %7 = arith.index_cast %c0_i32_8 : i32 to index
    %c0_9 = arith.constant 0 : index
    %c0_10 = arith.constant 0 : index
    %8 = vector.load %arg1[%7, %c0_9, %c0_10] : memref<8x8x512xbf16, #tpu.memory_space<vmem>>, vector<1x8x512xbf16>
    %9 = vector.shape_cast %8 : vector<1x8x512xbf16> to vector<8x512xbf16>
    %10 = arith.extf %9 : vector<8x512xbf16> to vector<8x512xf32>
    %11 = vector.broadcast %4 : vector<1x512xf32> to vector<8x512xf32>
    %12 = arith.addf %10, %11 : vector<8x512xf32>
    %13 = arith.truncf %5 : vector<8x128xf32> to vector<8x128xbf16>
    %cst = arith.constant dense<0.000000e+00> : vector<8x512xf32>
    %14 = tpu.matmul %13, %3, %cst {dimension_numbers = #tpu.dot_dimension_numbers<[1], [0], [0], [1], [0, 0, 1, 1], [], []>} : vector<8x128xbf16>, vector<128x512xbf16>, vector<8x512xf32> -> vector<8x512xf32>
    %15 = arith.addf %12, %14 : vector<8x512xf32>
    %16 = vector.extract_strided_slice %15 {offsets = [0, 0], sizes = [8, 128], strides = [1, 1]} : vector<8x512xf32> to vector<8x128xf32>
    %17 = arith.negf %16 : vector<8x128xf32>
    %18 = math.exp %17 : vector<8x128xf32>
    %cst_11 = arith.constant 1.000000e+00 : f32
    %19 = vector.broadcast %cst_11 : f32 to vector<8x128xf32>
    %20 = arith.addf %19, %18 : vector<8x128xf32>
    %21 = arith.divf %19, %20 : vector<8x128xf32>
    %22 = vector.extract_strided_slice %15 {offsets = [0, 128], sizes = [8, 128], strides = [1, 1]} : vector<8x512xf32> to vector<8x128xf32>
    %23 = arith.negf %22 : vector<8x128xf32>
    %24 = math.exp %23 : vector<8x128xf32>
    %cst_12 = arith.constant 1.000000e+00 : f32
    %25 = vector.broadcast %cst_12 : f32 to vector<8x128xf32>
    %26 = arith.addf %25, %24 : vector<8x128xf32>
    %27 = arith.divf %25, %26 : vector<8x128xf32>
    %28 = vector.extract_strided_slice %15 {offsets = [0, 256], sizes = [8, 128], strides = [1, 1]} : vector<8x512xf32> to vector<8x128xf32>
    %29 = math.tanh %28 : vector<8x128xf32>
    %30 = vector.extract_strided_slice %15 {offsets = [0, 384], sizes = [8, 128], strides = [1, 1]} : vector<8x512xf32> to vector<8x128xf32>
    %31 = arith.negf %30 : vector<8x128xf32>
    %32 = math.exp %31 : vector<8x128xf32>
    %cst_13 = arith.constant 1.000000e+00 : f32
    %33 = vector.broadcast %cst_13 : f32 to vector<8x128xf32>
    %34 = arith.addf %33, %32 : vector<8x128xf32>
    %35 = arith.divf %33, %34 : vector<8x128xf32>
    %36 = arith.mulf %27, %6 : vector<8x128xf32>
    %37 = arith.mulf %21, %29 : vector<8x128xf32>
    %38 = arith.addf %36, %37 : vector<8x128xf32>
    %39 = math.tanh %38 : vector<8x128xf32>
    %40 = arith.mulf %35, %39 : vector<8x128xf32>
    %41 = arith.index_cast %c0_i32_8 : i32 to index
    %c0_14 = arith.constant 0 : index
    %c0_15 = arith.constant 0 : index
    %42 = vector.load %arg4[%41, %c0_14, %c0_15] : memref<8x8x128xf32, #tpu.memory_space<vmem>>, vector<1x8x128xf32>
    %43 = vector.shape_cast %42 : vector<1x8x128xf32> to vector<8x128xf32>
    %44 = vector.shape_cast %40 : vector<8x128xf32> to vector<1x8x128xf32>
    tpu.vector_store %arg4[%41, %c0_14, %c0_15], %44 {strides = array<i32>} : memref<8x8x128xf32, #tpu.memory_space<vmem>>, vector<1x8x128xf32>,
    %c1_i32 = arith.constant 1 : i32
    %45 = arith.index_cast %c1_i32 : i32 to index
    %c0_16 = arith.constant 0 : index
    %c0_17 = arith.constant 0 : index
    %46 = vector.load %arg1[%45, %c0_16, %c0_17] : memref<8x8x512xbf16, #tpu.memory_space<vmem>>, vector<1x8x512xbf16>
    %47 = vector.shape_cast %46 : vector<1x8x512xbf16> to vector<8x512xbf16>
    %48 = arith.extf %47 : vector<8x512xbf16> to vector<8x512xf32>
    %49 = vector.broadcast %4 : vector<1x512xf32> to vector<8x512xf32>
    %50 = arith.addf %48, %49 : vector<8x512xf32>
    %51 = arith.truncf %40 : vector<8x128xf32> to vector<8x128xbf16>
    %cst_18 = arith.constant dense<0.000000e+00> : vector<8x512xf32>
    %52 = tpu.matmul %51, %3, %cst_18 {dimension_numbers = #tpu.dot_dimension_numbers<[1], [0], [0], [1], [0, 0, 1, 1], [], []>} : vector<8x128xbf16>, vector<128x512xbf16>, vector<8x512xf32> -> vector<8x512xf32>
    %53 = arith.addf %50, %52 : vector<8x512xf32>
    %54 = vector.extract_strided_slice %53 {offsets = [0, 0], sizes = [8, 128], strides = [1, 1]} : vector<8x512xf32> to vector<8x128xf32>
    %55 = arith.negf %54 : vector<8x128xf32>
    %56 = math.exp %55 : vector<8x128xf32>
    %cst_19 = arith.constant 1.000000e+00 : f32
    %57 = vector.broadcast %cst_19 : f32 to vector<8x128xf32>
    %58 = arith.addf %57, %56 : vector<8x128xf32>
    %59 = arith.divf %57, %58 : vector<8x128xf32>
    %60 = vector.extract_strided_slice %53 {offsets = [0, 128], sizes = [8, 128], strides = [1, 1]} : vector<8x512xf32> to vector<8x128xf32>
    %61 = arith.negf %60 : vector<8x128xf32>
    %62 = math.exp %61 : vector<8x128xf32>
    %cst_20 = arith.constant 1.000000e+00 : f32
    %63 = vector.broadcast %cst_20 : f32 to vector<8x128xf32>
    %64 = arith.addf %63, %62 : vector<8x128xf32>
    %65 = arith.divf %63, %64 : vector<8x128xf32>
    %66 = vector.extract_strided_slice %53 {offsets = [0, 256], sizes = [8, 128], strides = [1, 1]} : vector<8x512xf32> to vector<8x128xf32>
    %67 = math.tanh %66 : vector<8x128xf32>
    %68 = vector.extract_strided_slice %53 {offsets = [0, 384], sizes = [8, 128], strides = [1, 1]} : vector<8x512xf32> to vector<8x128xf32>
    %69 = arith.negf %68 : vector<8x128xf32>
    %70 = math.exp %69 : vector<8x128xf32>
    %cst_21 = arith.constant 1.000000e+00 : f32
    %71 = vector.broadcast %cst_21 : f32 to vector<8x128xf32>
    %72 = arith.addf %71, %70 : vector<8x128xf32>
    %73 = arith.divf %71, %72 : vector<8x128xf32>
    %74 = arith.mulf %65, %38 : vector<8x128xf32>
    %75 = arith.mulf %59, %67 : vector<8x128xf32>
    %76 = arith.addf %74, %75 : vector<8x128xf32>
    %77 = math.tanh %76 : vector<8x128xf32>
    %78 = arith.mulf %73, %77 : vector<8x128xf32>
    %79 = arith.index_cast %c1_i32 : i32 to index
    %c0_22 = arith.constant 0 : index
    %c0_23 = arith.constant 0 : index
    %80 = vector.load %arg4[%79, %c0_22, %c0_23] : memref<8x8x128xf32, #tpu.memory_space<vmem>>, vector<1x8x128xf32>
    %81 = vector.shape_cast %80 : vector<1x8x128xf32> to vector<8x128xf32>
    %82 = vector.shape_cast %78 : vector<8x128xf32> to vector<1x8x128xf32>
    tpu.vector_store %arg4[%79, %c0_22, %c0_23], %82 {strides = array<i32>} : memref<8x8x128xf32, #tpu.memory_space<vmem>>, vector<1x8x128xf32>,
    %c2_i32 = arith.constant 2 : i32
    %83 = arith.index_cast %c2_i32 : i32 to index
    %c0_24 = arith.constant 0 : index
    %c0_25 = arith.constant 0 : index
    %84 = vector.load %arg1[%83, %c0_24, %c0_25] : memref<8x8x512xbf16, #tpu.memory_space<vmem>>, vector<1x8x512xbf16>
    %85 = vector.shape_cast %84 : vector<1x8x512xbf16> to vector<8x512xbf16>
    %86 = arith.extf %85 : vector<8x512xbf16> to vector<8x512xf32>
    %87 = vector.broadcast %4 : vector<1x512xf32> to vector<8x512xf32>
    %88 = arith.addf %86, %87 : vector<8x512xf32>
    %89 = arith.truncf %78 : vector<8x128xf32> to vector<8x128xbf16>
    %cst_26 = arith.constant dense<0.000000e+00> : vector<8x512xf32>
    %90 = tpu.matmul %89, %3, %cst_26 {dimension_numbers = #tpu.dot_dimension_numbers<[1], [0], [0], [1], [0, 0, 1, 1], [], []>} : vector<8x128xbf16>, vector<128x512xbf16>, vector<8x512xf32> -> vector<8x512xf32>
    %91 = arith.addf %88, %90 : vector<8x512xf32>
    %92 = vector.extract_strided_slice %91 {offsets = [0, 0], sizes = [8, 128], strides = [1, 1]} : vector<8x512xf32> to vector<8x128xf32>
    %93 = arith.negf %92 : vector<8x128xf32>
    %94 = math.exp %93 : vector<8x128xf32>
    %cst_27 = arith.constant 1.000000e+00 : f32
    %95 = vector.broadcast %cst_27 : f32 to vector<8x128xf32>
    %96 = arith.addf %95, %94 : vector<8x128xf32>
    %97 = arith.divf %95, %96 : vector<8x128xf32>
    %98 = vector.extract_strided_slice %91 {offsets = [0, 128], sizes = [8, 128], strides = [1, 1]} : vector<8x512xf32> to vector<8x128xf32>
    %99 = arith.negf %98 : vector<8x128xf32>
    %100 = math.exp %99 : vector<8x128xf32>
    %cst_28 = arith.constant 1.000000e+00 : f32
    %101 = vector.broadcast %cst_28 : f32 to vector<8x128xf32>
    %102 = arith.addf %101, %100 : vector<8x128xf32>
    %103 = arith.divf %101, %102 : vector<8x128xf32>
    %104 = vector.extract_strided_slice %91 {offsets = [0, 256], sizes = [8, 128], strides = [1, 1]} : vector<8x512xf32> to vector<8x128xf32>
    %105 = math.tanh %104 : vector<8x128xf32>
    %106 = vector.extract_strided_slice %91 {offsets = [0, 384], sizes = [8, 128], strides = [1, 1]} : vector<8x512xf32> to vector<8x128xf32>
    %107 = arith.negf %106 : vector<8x128xf32>
    %108 = math.exp %107 : vector<8x128xf32>
    %cst_29 = arith.constant 1.000000e+00 : f32
    %109 = vector.broadcast %cst_29 : f32 to vector<8x128xf32>
    %110 = arith.addf %109, %108 : vector<8x128xf32>
    %111 = arith.divf %109, %110 : vector<8x128xf32>
    %112 = arith.mulf %103, %76 : vector<8x128xf32>
    %113 = arith.mulf %97, %105 : vector<8x128xf32>
    %114 = arith.addf %112, %113 : vector<8x128xf32>
    %115 = math.tanh %114 : vector<8x128xf32>
    %116 = arith.mulf %111, %115 : vector<8x128xf32>
    %117 = arith.index_cast %c2_i32 : i32 to index
    %c0_30 = arith.constant 0 : index
    %c0_31 = arith.constant 0 : index
    %118 = vector.load %arg4[%117, %c0_30, %c0_31] : memref<8x8x128xf32, #tpu.memory_space<vmem>>, vector<1x8x128xf32>
    %119 = vector.shape_cast %118 : vector<1x8x128xf32> to vector<8x128xf32>
    %120 = vector.shape_cast %116 : vector<8x128xf32> to vector<1x8x128xf32>
    tpu.vector_store %arg4[%117, %c0_30, %c0_31], %120 {strides = array<i32>} : memref<8x8x128xf32, #tpu.memory_space<vmem>>, vector<1x8x128xf32>,
    %c3_i32 = arith.constant 3 : i32
    %121 = arith.index_cast %c3_i32 : i32 to index
    %c0_32 = arith.constant 0 : index
    %c0_33 = arith.constant 0 : index
    %122 = vector.load %arg1[%121, %c0_32, %c0_33] : memref<8x8x512xbf16, #tpu.memory_space<vmem>>, vector<1x8x512xbf16>
    %123 = vector.shape_cast %122 : vector<1x8x512xbf16> to vector<8x512xbf16>
    %124 = arith.extf %123 : vector<8x512xbf16> to vector<8x512xf32>
    %125 = vector.broadcast %4 : vector<1x512xf32> to vector<8x512xf32>
    %126 = arith.addf %124, %125 : vector<8x512xf32>
    %127 = arith.truncf %116 : vector<8x128xf32> to vector<8x128xbf16>
    %cst_34 = arith.constant dense<0.000000e+00> : vector<8x512xf32>
    %128 = tpu.matmul %127, %3, %cst_34 {dimension_numbers = #tpu.dot_dimension_numbers<[1], [0], [0], [1], [0, 0, 1, 1], [], []>} : vector<8x128xbf16>, vector<128x512xbf16>, vector<8x512xf32> -> vector<8x512xf32>
    %129 = arith.addf %126, %128 : vector<8x512xf32>
    %130 = vector.extract_strided_slice %129 {offsets = [0, 0], sizes = [8, 128], strides = [1, 1]} : vector<8x512xf32> to vector<8x128xf32>
    %131 = arith.negf %130 : vector<8x128xf32>
    %132 = math.exp %131 : vector<8x128xf32>
    %cst_35 = arith.constant 1.000000e+00 : f32
    %133 = vector.broadcast %cst_35 : f32 to vector<8x128xf32>
    %134 = arith.addf %133, %132 : vector<8x128xf32>
    %135 = arith.divf %133, %134 : vector<8x128xf32>
    %136 = vector.extract_strided_slice %129 {offsets = [0, 128], sizes = [8, 128], strides = [1, 1]} : vector<8x512xf32> to vector<8x128xf32>
    %137 = arith.negf %136 : vector<8x128xf32>
    %138 = math.exp %137 : vector<8x128xf32>
    %cst_36 = arith.constant 1.000000e+00 : f32
    %139 = vector.broadcast %cst_36 : f32 to vector<8x128xf32>
    %140 = arith.addf %139, %138 : vector<8x128xf32>
    %141 = arith.divf %139, %140 : vector<8x128xf32>
    %142 = vector.extract_strided_slice %129 {offsets = [0, 256], sizes = [8, 128], strides = [1, 1]} : vector<8x512xf32> to vector<8x128xf32>
    %143 = math.tanh %142 : vector<8x128xf32>
    %144 = vector.extract_strided_slice %129 {offsets = [0, 384], sizes = [8, 128], strides = [1, 1]} : vector<8x512xf32> to vector<8x128xf32>
    %145 = arith.negf %144 : vector<8x128xf32>
    %146 = math.exp %145 : vector<8x128xf32>
    %cst_37 = arith.constant 1.000000e+00 : f32
    %147 = vector.broadcast %cst_37 : f32 to vector<8x128xf32>
    %148 = arith.addf %147, %146 : vector<8x128xf32>
    %149 = arith.divf %147, %148 : vector<8x128xf32>
    %150 = arith.mulf %141, %114 : vector<8x128xf32>
    %151 = arith.mulf %135, %143 : vector<8x128xf32>
    %152 = arith.addf %150, %151 : vector<8x128xf32>
    %153 = math.tanh %152 : vector<8x128xf32>
    %154 = arith.mulf %149, %153 : vector<8x128xf32>
    %155 = arith.index_cast %c3_i32 : i32 to index
    %c0_38 = arith.constant 0 : index
    %c0_39 = arith.constant 0 : index
    %156 = vector.load %arg4[%155, %c0_38, %c0_39] : memref<8x8x128xf32, #tpu.memory_space<vmem>>, vector<1x8x128xf32>
    %157 = vector.shape_cast %156 : vector<1x8x128xf32> to vector<8x128xf32>
    %158 = vector.shape_cast %154 : vector<8x128xf32> to vector<1x8x128xf32>
    tpu.vector_store %arg4[%155, %c0_38, %c0_39], %158 {strides = array<i32>} : memref<8x8x128xf32, #tpu.memory_space<vmem>>, vector<1x8x128xf32>,
    %c4_i32 = arith.constant 4 : i32
    %159 = arith.index_cast %c4_i32 : i32 to index
    %c0_40 = arith.constant 0 : index
    %c0_41 = arith.constant 0 : index
    %160 = vector.load %arg1[%159, %c0_40, %c0_41] : memref<8x8x512xbf16, #tpu.memory_space<vmem>>, vector<1x8x512xbf16>
    %161 = vector.shape_cast %160 : vector<1x8x512xbf16> to vector<8x512xbf16>
    %162 = arith.extf %161 : vector<8x512xbf16> to vector<8x512xf32>
    %163 = vector.broadcast %4 : vector<1x512xf32> to vector<8x512xf32>
    %164 = arith.addf %162, %163 : vector<8x512xf32>
    %165 = arith.truncf %154 : vector<8x128xf32> to vector<8x128xbf16>
    %cst_42 = arith.constant dense<0.000000e+00> : vector<8x512xf32>
    %166 = tpu.matmul %165, %3, %cst_42 {dimension_numbers = #tpu.dot_dimension_numbers<[1], [0], [0], [1], [0, 0, 1, 1], [], []>} : vector<8x128xbf16>, vector<128x512xbf16>, vector<8x512xf32> -> vector<8x512xf32>
    %167 = arith.addf %164, %166 : vector<8x512xf32>
    %168 = vector.extract_strided_slice %167 {offsets = [0, 0], sizes = [8, 128], strides = [1, 1]} : vector<8x512xf32> to vector<8x128xf32>
    %169 = arith.negf %168 : vector<8x128xf32>
    %170 = math.exp %169 : vector<8x128xf32>
    %cst_43 = arith.constant 1.000000e+00 : f32
    %171 = vector.broadcast %cst_43 : f32 to vector<8x128xf32>
    %172 = arith.addf %171, %170 : vector<8x128xf32>
    %173 = arith.divf %171, %172 : vector<8x128xf32>
    %174 = vector.extract_strided_slice %167 {offsets = [0, 128], sizes = [8, 128], strides = [1, 1]} : vector<8x512xf32> to vector<8x128xf32>
    %175 = arith.negf %174 : vector<8x128xf32>
    %176 = math.exp %175 : vector<8x128xf32>
    %cst_44 = arith.constant 1.000000e+00 : f32
    %177 = vector.broadcast %cst_44 : f32 to vector<8x128xf32>
    %178 = arith.addf %177, %176 : vector<8x128xf32>
    %179 = arith.divf %177, %178 : vector<8x128xf32>
    %180 = vector.extract_strided_slice %167 {offsets = [0, 256], sizes = [8, 128], strides = [1, 1]} : vector<8x512xf32> to vector<8x128xf32>
    %181 = math.tanh %180 : vector<8x128xf32>
    %182 = vector.extract_strided_slice %167 {offsets = [0, 384], sizes = [8, 128], strides = [1, 1]} : vector<8x512xf32> to vector<8x128xf32>
    %183 = arith.negf %182 : vector<8x128xf32>
    %184 = math.exp %183 : vector<8x128xf32>
    %cst_45 = arith.constant 1.000000e+00 : f32
    %185 = vector.broadcast %cst_45 : f32 to vector<8x128xf32>
    %186 = arith.addf %185, %184 : vector<8x128xf32>
    %187 = arith.divf %185, %186 : vector<8x128xf32>
    %188 = arith.mulf %179, %152 : vector<8x128xf32>
    %189 = arith.mulf %173, %181 : vector<8x128xf32>
    %190 = arith.addf %188, %189 : vector<8x128xf32>
    %191 = math.tanh %190 : vector<8x128xf32>
    %192 = arith.mulf %187, %191 : vector<8x128xf32>
    %193 = arith.index_cast %c4_i32 : i32 to index
    %c0_46 = arith.constant 0 : index
    %c0_47 = arith.constant 0 : index
    %194 = vector.load %arg4[%193, %c0_46, %c0_47] : memref<8x8x128xf32, #tpu.memory_space<vmem>>, vector<1x8x128xf32>
    %195 = vector.shape_cast %194 : vector<1x8x128xf32> to vector<8x128xf32>
    %196 = vector.shape_cast %192 : vector<8x128xf32> to vector<1x8x128xf32>
    tpu.vector_store %arg4[%193, %c0_46, %c0_47], %196 {strides = array<i32>} : memref<8x8x128xf32, #tpu.memory_space<vmem>>, vector<1x8x128xf32>,
    %c5_i32 = arith.constant 5 : i32
    %197 = arith.index_cast %c5_i32 : i32 to index
    %c0_48 = arith.constant 0 : index
    %c0_49 = arith.constant 0 : index
    %198 = vector.load %arg1[%197, %c0_48, %c0_49] : memref<8x8x512xbf16, #tpu.memory_space<vmem>>, vector<1x8x512xbf16>
    %199 = vector.shape_cast %198 : vector<1x8x512xbf16> to vector<8x512xbf16>
    %200 = arith.extf %199 : vector<8x512xbf16> to vector<8x512xf32>
    %201 = vector.broadcast %4 : vector<1x512xf32> to vector<8x512xf32>
    %202 = arith.addf %200, %201 : vector<8x512xf32>
    %203 = arith.truncf %192 : vector<8x128xf32> to vector<8x128xbf16>
    %cst_50 = arith.constant dense<0.000000e+00> : vector<8x512xf32>
    %204 = tpu.matmul %203, %3, %cst_50 {dimension_numbers = #tpu.dot_dimension_numbers<[1], [0], [0], [1], [0, 0, 1, 1], [], []>} : vector<8x128xbf16>, vector<128x512xbf16>, vector<8x512xf32> -> vector<8x512xf32>
    %205 = arith.addf %202, %204 : vector<8x512xf32>
    %206 = vector.extract_strided_slice %205 {offsets = [0, 0], sizes = [8, 128], strides = [1, 1]} : vector<8x512xf32> to vector<8x128xf32>
    %207 = arith.negf %206 : vector<8x128xf32>
    %208 = math.exp %207 : vector<8x128xf32>
    %cst_51 = arith.constant 1.000000e+00 : f32
    %209 = vector.broadcast %cst_51 : f32 to vector<8x128xf32>
    %210 = arith.addf %209, %208 : vector<8x128xf32>
    %211 = arith.divf %209, %210 : vector<8x128xf32>
    %212 = vector.extract_strided_slice %205 {offsets = [0, 128], sizes = [8, 128], strides = [1, 1]} : vector<8x512xf32> to vector<8x128xf32>
    %213 = arith.negf %212 : vector<8x128xf32>
    %214 = math.exp %213 : vector<8x128xf32>
    %cst_52 = arith.constant 1.000000e+00 : f32
    %215 = vector.broadcast %cst_52 : f32 to vector<8x128xf32>
    %216 = arith.addf %215, %214 : vector<8x128xf32>
    %217 = arith.divf %215, %216 : vector<8x128xf32>
    %218 = vector.extract_strided_slice %205 {offsets = [0, 256], sizes = [8, 128], strides = [1, 1]} : vector<8x512xf32> to vector<8x128xf32>
    %219 = math.tanh %218 : vector<8x128xf32>
    %220 = vector.extract_strided_slice %205 {offsets = [0, 384], sizes = [8, 128], strides = [1, 1]} : vector<8x512xf32> to vector<8x128xf32>
    %221 = arith.negf %220 : vector<8x128xf32>
    %222 = math.exp %221 : vector<8x128xf32>
    %cst_53 = arith.constant 1.000000e+00 : f32
    %223 = vector.broadcast %cst_53 : f32 to vector<8x128xf32>
    %224 = arith.addf %223, %222 : vector<8x128xf32>
    %225 = arith.divf %223, %224 : vector<8x128xf32>
    %226 = arith.mulf %217, %190 : vector<8x128xf32>
    %227 = arith.mulf %211, %219 : vector<8x128xf32>
    %228 = arith.addf %226, %227 : vector<8x128xf32>
    %229 = math.tanh %228 : vector<8x128xf32>
    %230 = arith.mulf %225, %229 : vector<8x128xf32>
    %231 = arith.index_cast %c5_i32 : i32 to index
    %c0_54 = arith.constant 0 : index
    %c0_55 = arith.constant 0 : index
    %232 = vector.load %arg4[%231, %c0_54, %c0_55] : memref<8x8x128xf32, #tpu.memory_space<vmem>>, vector<1x8x128xf32>
    %233 = vector.shape_cast %232 : vector<1x8x128xf32> to vector<8x128xf32>
    %234 = vector.shape_cast %230 : vector<8x128xf32> to vector<1x8x128xf32>
    tpu.vector_store %arg4[%231, %c0_54, %c0_55], %234 {strides = array<i32>} : memref<8x8x128xf32, #tpu.memory_space<vmem>>, vector<1x8x128xf32>,
    %c6_i32 = arith.constant 6 : i32
    %235 = arith.index_cast %c6_i32 : i32 to index
    %c0_56 = arith.constant 0 : index
    %c0_57 = arith.constant 0 : index
    %236 = vector.load %arg1[%235, %c0_56, %c0_57] : memref<8x8x512xbf16, #tpu.memory_space<vmem>>, vector<1x8x512xbf16>
    %237 = vector.shape_cast %236 : vector<1x8x512xbf16> to vector<8x512xbf16>
    %238 = arith.extf %237 : vector<8x512xbf16> to vector<8x512xf32>
    %239 = vector.broadcast %4 : vector<1x512xf32> to vector<8x512xf32>
    %240 = arith.addf %238, %239 : vector<8x512xf32>
    %241 = arith.truncf %230 : vector<8x128xf32> to vector<8x128xbf16>
    %cst_58 = arith.constant dense<0.000000e+00> : vector<8x512xf32>
    %242 = tpu.matmul %241, %3, %cst_58 {dimension_numbers = #tpu.dot_dimension_numbers<[1], [0], [0], [1], [0, 0, 1, 1], [], []>} : vector<8x128xbf16>, vector<128x512xbf16>, vector<8x512xf32> -> vector<8x512xf32>
    %243 = arith.addf %240, %242 : vector<8x512xf32>
    %244 = vector.extract_strided_slice %243 {offsets = [0, 0], sizes = [8, 128], strides = [1, 1]} : vector<8x512xf32> to vector<8x128xf32>
    %245 = arith.negf %244 : vector<8x128xf32>
    %246 = math.exp %245 : vector<8x128xf32>
    %cst_59 = arith.constant 1.000000e+00 : f32
    %247 = vector.broadcast %cst_59 : f32 to vector<8x128xf32>
    %248 = arith.addf %247, %246 : vector<8x128xf32>
    %249 = arith.divf %247, %248 : vector<8x128xf32>
    %250 = vector.extract_strided_slice %243 {offsets = [0, 128], sizes = [8, 128], strides = [1, 1]} : vector<8x512xf32> to vector<8x128xf32>
    %251 = arith.negf %250 : vector<8x128xf32>
    %252 = math.exp %251 : vector<8x128xf32>
    %cst_60 = arith.constant 1.000000e+00 : f32
    %253 = vector.broadcast %cst_60 : f32 to vector<8x128xf32>
    %254 = arith.addf %253, %252 : vector<8x128xf32>
    %255 = arith.divf %253, %254 : vector<8x128xf32>
    %256 = vector.extract_strided_slice %243 {offsets = [0, 256], sizes = [8, 128], strides = [1, 1]} : vector<8x512xf32> to vector<8x128xf32>
    %257 = math.tanh %256 : vector<8x128xf32>
    %258 = vector.extract_strided_slice %243 {offsets = [0, 384], sizes = [8, 128], strides = [1, 1]} : vector<8x512xf32> to vector<8x128xf32>
    %259 = arith.negf %258 : vector<8x128xf32>
    %260 = math.exp %259 : vector<8x128xf32>
    %cst_61 = arith.constant 1.000000e+00 : f32
    %261 = vector.broadcast %cst_61 : f32 to vector<8x128xf32>
    %262 = arith.addf %261, %260 : vector<8x128xf32>
    %263 = arith.divf %261, %262 : vector<8x128xf32>
    %264 = arith.mulf %255, %228 : vector<8x128xf32>
    %265 = arith.mulf %249, %257 : vector<8x128xf32>
    %266 = arith.addf %264, %265 : vector<8x128xf32>
    %267 = math.tanh %266 : vector<8x128xf32>
    %268 = arith.mulf %263, %267 : vector<8x128xf32>
    %269 = arith.index_cast %c6_i32 : i32 to index
    %c0_62 = arith.constant 0 : index
    %c0_63 = arith.constant 0 : index
    %270 = vector.load %arg4[%269, %c0_62, %c0_63] : memref<8x8x128xf32, #tpu.memory_space<vmem>>, vector<1x8x128xf32>
    %271 = vector.shape_cast %270 : vector<1x8x128xf32> to vector<8x128xf32>
    %272 = vector.shape_cast %268 : vector<8x128xf32> to vector<1x8x128xf32>
    tpu.vector_store %arg4[%269, %c0_62, %c0_63], %272 {strides = array<i32>} : memref<8x8x128xf32, #tpu.memory_space<vmem>>, vector<1x8x128xf32>,
    %c7_i32 = arith.constant 7 : i32
    %273 = arith.index_cast %c7_i32 : i32 to index
    %c0_64 = arith.constant 0 : index
    %c0_65 = arith.constant 0 : index
    %274 = vector.load %arg1[%273, %c0_64, %c0_65] : memref<8x8x512xbf16, #tpu.memory_space<vmem>>, vector<1x8x512xbf16>
    %275 = vector.shape_cast %274 : vector<1x8x512xbf16> to vector<8x512xbf16>
    %276 = arith.extf %275 : vector<8x512xbf16> to vector<8x512xf32>
    %277 = vector.broadcast %4 : vector<1x512xf32> to vector<8x512xf32>
    %278 = arith.addf %276, %277 : vector<8x512xf32>
    %279 = arith.truncf %268 : vector<8x128xf32> to vector<8x128xbf16>
    %cst_66 = arith.constant dense<0.000000e+00> : vector<8x512xf32>
    %280 = tpu.matmul %279, %3, %cst_66 {dimension_numbers = #tpu.dot_dimension_numbers<[1], [0], [0], [1], [0, 0, 1, 1], [], []>} : vector<8x128xbf16>, vector<128x512xbf16>, vector<8x512xf32> -> vector<8x512xf32>
    %281 = arith.addf %278, %280 : vector<8x512xf32>
    %282 = vector.extract_strided_slice %281 {offsets = [0, 0], sizes = [8, 128], strides = [1, 1]} : vector<8x512xf32> to vector<8x128xf32>
    %283 = arith.negf %282 : vector<8x128xf32>
    %284 = math.exp %283 : vector<8x128xf32>
    %cst_67 = arith.constant 1.000000e+00 : f32
    %285 = vector.broadcast %cst_67 : f32 to vector<8x128xf32>
    %286 = arith.addf %285, %284 : vector<8x128xf32>
    %287 = arith.divf %285, %286 : vector<8x128xf32>
    %288 = vector.extract_strided_slice %281 {offsets = [0, 128], sizes = [8, 128], strides = [1, 1]} : vector<8x512xf32> to vector<8x128xf32>
    %289 = arith.negf %288 : vector<8x128xf32>
    %290 = math.exp %289 : vector<8x128xf32>
    %cst_68 = arith.constant 1.000000e+00 : f32
    %291 = vector.broadcast %cst_68 : f32 to vector<8x128xf32>
    %292 = arith.addf %291, %290 : vector<8x128xf32>
    %293 = arith.divf %291, %292 : vector<8x128xf32>
    %294 = vector.extract_strided_slice %281 {offsets = [0, 256], sizes = [8, 128], strides = [1, 1]} : vector<8x512xf32> to vector<8x128xf32>
    %295 = math.tanh %294 : vector<8x128xf32>
    %296 = vector.extract_strided_slice %281 {offsets = [0, 384], sizes = [8, 128], strides = [1, 1]} : vector<8x512xf32> to vector<8x128xf32>
    %297 = arith.negf %296 : vector<8x128xf32>
    %298 = math.exp %297 : vector<8x128xf32>
    %cst_69 = arith.constant 1.000000e+00 : f32
    %299 = vector.broadcast %cst_69 : f32 to vector<8x128xf32>
    %300 = arith.addf %299, %298 : vector<8x128xf32>
    %301 = arith.divf %299, %300 : vector<8x128xf32>
    %302 = arith.mulf %293, %266 : vector<8x128xf32>
    %303 = arith.mulf %287, %295 : vector<8x128xf32>
    %304 = arith.addf %302, %303 : vector<8x128xf32>
    %305 = math.tanh %304 : vector<8x128xf32>
    %306 = arith.mulf %301, %305 : vector<8x128xf32>
    %307 = arith.index_cast %c7_i32 : i32 to index
    %c0_70 = arith.constant 0 : index
    %c0_71 = arith.constant 0 : index
    %308 = vector.load %arg4[%307, %c0_70, %c0_71] : memref<8x8x128xf32, #tpu.memory_space<vmem>>, vector<1x8x128xf32>
    %309 = vector.shape_cast %308 : vector<1x8x128xf32> to vector<8x128xf32>
    %310 = vector.shape_cast %306 : vector<8x128xf32> to vector<1x8x128xf32>
    tpu.vector_store %arg4[%307, %c0_70, %c0_71], %310 {strides = array<i32>} : memref<8x8x128xf32, #tpu.memory_space<vmem>>, vector<1x8x128xf32>,
    %c8_i32 = arith.constant 8 : i32
    %c0_72 = arith.constant 0 : index
    %c0_73 = arith.constant 0 : index
    %311 = vector.load %arg7[%c0_72, %c0_73] : memref<8x128xf32, #tpu.memory_space<vmem>>, vector<8x128xf32>
    tpu.vector_store %arg7[%c0_72, %c0_73], %306 {strides = array<i32>} : memref<8x128xf32, #tpu.memory_space<vmem>>, vector<8x128xf32>,
    %c0_74 = arith.constant 0 : index
    %c0_75 = arith.constant 0 : index
    %312 = vector.load %arg8[%c0_74, %c0_75] : memref<8x128xf32, #tpu.memory_space<vmem>>, vector<8x128xf32>
    tpu.vector_store %arg8[%c0_74, %c0_75], %304 {strides = array<i32>} : memref<8x128xf32, #tpu.memory_space<vmem>>, vector<8x128xf32>,
    %c0_i32_76 = arith.constant 0 : i32
    %313 = arith.cmpi eq, %arg0, %c0_i32_76 : i32
    %314 = arith.extui %313 : i1 to i32
    %c0_i32_77 = arith.constant 0 : i32
    %315 = arith.cmpi ne, %314, %c0_i32_77 : i32
    scf.if %315 {
      %c0_78 = arith.constant 0 : index
      %c0_79 = arith.constant 0 : index
      %316 = vector.load %arg5[%c0_78, %c0_79] : memref<8x128xf32, #tpu.memory_space<vmem>>, vector<8x128xf32>
      tpu.vector_store %arg5[%c0_78, %c0_79], %306 {strides = array<i32>} : memref<8x128xf32, #tpu.memory_space<vmem>>, vector<8x128xf32>,
      %c0_80 = arith.constant 0 : index
      %c0_81 = arith.constant 0 : index
      %317 = vector.load %arg6[%c0_80, %c0_81] : memref<8x128xf32, #tpu.memory_space<vmem>>, vector<8x128xf32>
      tpu.vector_store %arg6[%c0_80, %c0_81], %304 {strides = array<i32>} : memref<8x128xf32, #tpu.memory_space<vmem>>, vector<8x128xf32>,
    } else {
    }
    return
  }
  func.func @transform_0(%arg0: i32) -> (i32, i32, i32) {
    %c0_i32 = arith.constant 0 : i32
    %c0_i32_0 = arith.constant 0 : i32
    %c0_i32_1 = arith.constant 0 : i32
    return %arg0, %c0_i32, %c0_i32_0 : i32, i32, i32
  }
  func.func @transform_1(%arg0: i32) -> (i32, i32) {
    %c0_i32 = arith.constant 0 : i32
    %c0_i32_0 = arith.constant 0 : i32
    %c0_i32_1 = arith.constant 0 : i32
    return %c0_i32, %c0_i32_0 : i32, i32
  }
  func.func @transform_3(%arg0: i32) -> (i32, i32, i32) {
    %c0_i32 = arith.constant 0 : i32
    %c0_i32_0 = arith.constant 0 : i32
    %c0_i32_1 = arith.constant 0 : i32
    return %arg0, %c0_i32, %c0_i32_0 : i32, i32, i32
  }
  func.func @transform_4(%arg0: i32) -> (i32, i32) {
    %c0_i32 = arith.constant 0 : i32
    %c0_i32_0 = arith.constant 0 : i32
    %c0_i32_1 = arith.constant 0 : i32
    return %c0_i32, %c0_i32_0 : i32, i32
  }
  func.func @transform_5(%arg0: i32) -> (i32, i32) {
    %c0_i32 = arith.constant 0 : i32
    %c0_i32_0 = arith.constant 0 : i32
    %c0_i32_1 = arith.constant 0 : i32
    return %c0_i32, %c0_i32_0 : i32, i32
  }
}

</mosaic_0001>

<bundles_post_ra>
// kernel: tpu_custom_call.1
= control target key start
LH: loop header
LB: loop body
LE: loop exit
PB: predicated region body
PF: predicated region fallthrough
CT: control target
= control target key end

     0   :  { %11 = vsyncpa [#allocation6], 0  ;;  %s2014_s0 = inlined_call_operand.hbm [shape: bf16[8,8,512], index: 0, kind: input, shape index: {}]   ;;  %s2015_s1 = inlined_call_operand.hbm [shape: f32[1,512], index: 1, kind: input, shape index: {}]   ;;  %s2016_s2 = inlined_call_operand.hbm [shape: bf16[128,512], index: 2, kind: input, shape index: {}]   ;;  %s2017_s3 = inlined_call_operand.hbm [shape: f32[8,8,128], index: 3, kind: output, shape index: {0}]   ;;  %s2018_s4 = inlined_call_operand.hbm [shape: f32[8,128], index: 4, kind: output, shape index: {1}]   ;;  %s2019_s5 = inlined_call_operand.hbm [shape: f32[8,128], index: 5, kind: output, shape index: {2}]  }
   0x1   :  { %12 = vsyncpa [#allocation9], 0 }
   0x2   :  { %13 = vsyncpa [#allocation7], 0 }
   0x3   :  { %14 = vsyncpa [#allocation12], 0  ;;  %s1513_s18 = smov [#allocation5]   ;;  %s1393_s22 = scalar_lea.hbm %s2014_s0, 2048 }
   0x4   :  { %s20_s19 = sshll.u32 %s1513_s18, 4  ;;  %p1394_p0 = scmp.ne.s32.totalorder %s2014_s0, %s1393_s22  ;;  %s21_s19 = int_to_ptr.vmem [resolvable:$true] %s20_s19 }
   0x5   :  { %p1397_p1 = scmp.lt.u32.totalorder %s1393_s22, %s2014_s0 }
   0x7   :  { %p1399_p2 = pnand %p1397_p1, %p1394_p0 }
   0x9   :  { %1402 = shalt.err (!%p1399_p2)
}
   0xa   :  { %s1403_s27 = scalar_lea.vmem %s21_s19, 2048  ;;  %p1408_p4 = scmp.lt.s32.totalorder %s21_s19, %s21_s19 }
   0xb   :  { %p1404_p3 = scmp.ne.s32.totalorder %s21_s19, %s1403_s27  ;;  %p1409_p5 = scmp.lt.s32.totalorder %s1403_s27, %s1403_s27 }
   0xd   :  { %p1410_p6 = por %p1409_p5, %p1408_p4 }
   0xf   :  { %p1411_p7 = pnand %p1410_p6, %p1404_p3 }
  0x11   :  { %1414 = shalt.err (!%p1411_p7)
}
  0x12   :  { %s1514_s28 = smov 256   ;;  %s1515_s29 = smov 16  }
  0x13   :  { %26 = dma.hbm_to_vmem [thread:$0]  %s2014_s0, 2048, %s21_s19, [#allocation6], %s1514_s28, %s1514_s28, %s1515_s29  }
  0x14   :  { %s1516_s7 = smov [#allocation8]   ;;  %s1415_s11 = scalar_lea.hbm %s2015_s1, 64 }
  0x15   :  { %s33_s8 = sshll.u32 %s1516_s7, 4  ;;  %p1416_p8 = scmp.ne.s32.totalorder %s2015_s1, %s1415_s11  ;;  %s34_s8 = int_to_ptr.vmem [resolvable:$true] %s33_s8 }
  0x16   :  { %p1419_p9 = scmp.lt.u32.totalorder %s1415_s11, %s2015_s1 }
  0x18   :  { %p1421_p10 = pnand %p1419_p9, %p1416_p8 }
  0x1a   :  { %1424 = shalt.err (!%p1421_p10)
}
  0x1b   :  { %s1425_s16 = scalar_lea.vmem %s34_s8, 64  ;;  %p1430_p12 = scmp.lt.s32.totalorder %s34_s8, %s34_s8 }
  0x1c   :  { %p1426_p11 = scmp.ne.s32.totalorder %s34_s8, %s1425_s16  ;;  %p1431_p13 = scmp.lt.s32.totalorder %s1425_s16, %s1425_s16 }
  0x1e   :  { %p1432_p0 = por %p1431_p13, %p1430_p12 }
  0x20   :  { %p1433_p1 = pnand %p1432_p0, %p1426_p11 }
  0x22   :  { %1436 = shalt.err (!%p1433_p1)
}
  0x23   :  { %36 = dma.hbm_to_vmem [thread:$0]  %s2015_s1, 64, %s34_s8, [#allocation9]  }
  0x24   :  { %1503 = dma.done.wait [#allocation6], 2048  }
  0x25   :  { %1504 = vsyncadd [#allocation6], 4294965248 }
  0x26   :  { %1505 = dma.done.wait [#allocation9], 64  }
  0x27   :  { %1506 = vsyncadd [#allocation9], 4294967232 }
  0x28   :  { %s52_s18 = sld [smem:[#allocation0]]   ;;  %s1517_s19 = smov [#allocation4]  }
  0x29   :  { %s60_s20 = sshll.u32 %s1517_s19, 4  ;;  %s1518_s21 = smov 512   ;;  %s61_s20 = int_to_ptr.vmem [resolvable:$true] %s60_s20 }
  0x2a   :  { %64 = sst [smem:[#allocation16]] %s1518_s21  ;;  %s1519_s22 = smov 4  }
  0x2b   :  { %66 = sst [smem:[#allocation16 + $0x1]] %s1518_s21  ;;  %s1520_s23 = smov 64  }
  0x2c   :  { %68 = sst [smem:[#allocation16 + $0x2]] %s1519_s22  ;;  %s1521_s25 = smov 128  }
  0x2d   :  { %70 = sst [smem:[#allocation16 + $0x3]] %s1520_s23  ;;  %s1522_s1 = smov 2  }
  0x2e   :  { %s1187_s24 = sshll.u32 %s52_s18, 26  ;;  %72 = sst [smem:[#allocation16 + $0x4]] %s1521_s25 }
  0x2f   :  { %s1188_s26 = sadd.s32 134217728, %s1187_s24  ;;  %74 = sst [smem:[#allocation16 + $0x5]] %s1522_s1 }
  0x30   :  { %s1523_s27 = smov 256   ;;  %78 = sst [smem:[#allocation16 + $0x7]] %s1520_s23 }
  0x31   :  { %76 = sst [smem:[#allocation16 + $0x6]] %s1523_s27  ;;  %s1524_s28 = smov [#allocation14]  }
  0x32   :  { %80 = sst [smem:[#allocation16 + $0x8]] %s1519_s22  ;;  %s1525_s29 = smov [#allocation15]  }
  0x33   :  { %82 = dma.general %s2016_s2, 4096, %s61_s20, %s1524_s28, %s1525_s29, [#allocation16], %s1188_s26, 0  }
  0x34   :  { %1507 = dma.done.wait [#allocation14], 4096 }
  0x35   :  { %1508 = vsyncadd [#allocation14], 4294963200  ;;  %v1590_v0 = vld [vmem:[#allocation4 + $0x8] sm:$0xff]  ;;  %v1592_v1 = vld [vmem:[#allocation4] sm:$0xff]  ;;  %v1526_v3 = vmov 0   ;;  %v1527_v33 = vmov 0.0|0.0   ;;  %v131_v34 = vlaneseq }
  0x36   :  { %v1594_v2 = vld [vmem:[#allocation4 + $0x28] sm:$0xff]  ;;  %156 = vmatprep.subr.bf16.mxu0 %v1590_v0  ;;  %188 = vmatprep.mubr.bf16.mxu0 %v1526_v3  ;;  %v1599_v4 = vld [vmem:[#allocation4 + $0x18] sm:$0xff]  ;;  %v1603_v5 = vld [vmem:[#allocation4 + $0x20] sm:$0xff]  ;;  %s1528_s2 = smov [#allocation11]   ;;  %s1529_s8 = smov [#allocation10]  }
  0x37   :  { %157 = vmatpush1.bf16.msra.mxu0 %v1592_v1  ;;  %229 = vmatprep.mubr.bf16.mxu1 %v1526_v3  ;;  %v1606_v6 = vld [vmem:[#allocation4 + $0x10] sm:$0xff]  ;;  %v1608_v7 = vld [vmem:[#allocation4 + $0x38] sm:$0xff]  ;;  %v1610_v8 = vld [vmem:[#allocation4 + $0x48] sm:$0xff]  ;;  %v132_v35 = vshrl.u32 %v131_v34, 7  ;;  %s1160_s7 = sshll.u32 %s1528_s2, 4  ;;  %s1147_s9 = sshll.u32 %s1529_s8, 4  ;;  %s1161_s7 = int_to_ptr.vmem [resolvable:$true] %s1160_s7  ;;  %s1964_s9 = int_to_ptr.vmem [resolvable:$true] %s1147_s9 }
  0x38   :  { %158 = vmatprep.subr.bf16.mxu0 %v1594_v2  ;;  %197 = vmatprep.subr.bf16.mxu1 %v1599_v4  ;;  %v1614_v9 = vld [vmem:[#allocation4 + $0x30] sm:$0xff]  ;;  %v1617_v10 = vld [vmem:[#allocation4 + $0x58] sm:$0xff]  ;;  %v1620_v11 = vld [vmem:[#allocation4 + $0x40] sm:$0xff]  ;;  %s1530_s10 = smov [#allocation13]   ;;  %s1437_s12 = scalar_lea.vmem %s1161_s7, 128 }
  0x39   :  { %198 = vmatpush1.bf16.msra.mxu1 %v1606_v6  ;;  %v1622_v12 = vld [vmem:[#allocation4 + $0x68] sm:$0xff]  ;;  %v1626_v13 = vld [vmem:[#allocation4 + $0x50] sm:$0xff]  ;;  %v1629_v14 = vld [vmem:[#allocation4 + $0x78] sm:$0xff]  ;;  %v133_v36 = vsub.s32 0, %v132_v35  ;;  %v137_v39 = vsub.s32 1, %v132_v35  ;;  %v145_v44 = vsub.s32 3, %v132_v35  ;;  %p1438_p2 = scmp.ne.s32.totalorder %s1161_s7, %s1437_s12  ;;  %p1442_p3 = scmp.lt.s32.totalorder %s1161_s7, %s1161_s7 }
  0x3a   :  { %199 = vmatprep.subr.bf16.mxu1 %v1608_v7  ;;  %v1632_v15 = vld [vmem:[#allocation4 + $0x60] sm:$0xff]  ;;  %v1634_v16 = vld [vmem:[#allocation4 + $0x88] sm:$0xff]  ;;  %v1638_v17 = vld [vmem:[#allocation4 + $0x70] sm:$0xff]  ;;  %v141_v51 = vsub.s32 2, %v132_v35  ;;  %s1170_s11 = sshll.u32 %s1530_s10, 4  ;;  %p1443_p4 = scmp.lt.s32.totalorder %s1437_s12, %s1437_s12  ;;  %s1966_s11 = int_to_ptr.vmem [resolvable:$true] %s1170_s11 }
  0x3b   :  { %159 = vmatpush1.bf16.msra.mxu0 %v1603_v5  ;;  %v1641_v18 = vld [vmem:[#allocation4 + $0x98] sm:$0xff]  ;;  %v1644_v19 = vld [vmem:[#allocation4 + $0x80] sm:$0xff]  ;;  %v1646_v20 = vld [vmem:[#allocation4 + $0xa8] sm:$0xff] }
  0x3c   :  { %160 = vmatprep.subr.bf16.mxu0 %v1610_v8  ;;  %v1650_v21 = vld [vmem:[#allocation4 + $0x90] sm:$0xff]  ;;  %v1653_v22 = vld [vmem:[#allocation4 + $0xb8] sm:$0xff]  ;;  %v1656_v23 = vld [vmem:[#allocation4 + $0xa0] sm:$0xff]  ;;  %p1444_p5 = por %p1443_p4, %p1442_p3 }
  0x3d   :  { %200 = vmatpush1.bf16.msra.mxu1 %v1614_v9  ;;  %v1658_v24 = vld [vmem:[#allocation4 + $0xc8] sm:$0xff]  ;;  %v1662_v25 = vld [vmem:[#allocation4 + $0xb0] sm:$0xff]  ;;  %v1665_v26 = vld [vmem:[#allocation4 + $0xd8] sm:$0xff] }
  0x3e   :  { %201 = vmatprep.subr.bf16.mxu1 %v1617_v10  ;;  %v1668_v27 = vld [vmem:[#allocation4 + $0xc0] sm:$0xff]  ;;  %v1670_v28 = vld [vmem:[#allocation4 + $0xe8] sm:$0xff]  ;;  %v1674_v29 = vld [vmem:[#allocation4 + $0xd0] sm:$0xff]  ;;  %p1445_p6 = pnand %p1444_p5, %p1438_p2 }
  0x3f   :  { %161 = vmatpush1.bf16.msra.mxu0 %v1620_v11  ;;  %v1677_v30 = vld [vmem:[#allocation4 + $0xf8] sm:$0xff]  ;;  %v1680_v31 = vld [vmem:[#allocation4 + $0xe0] sm:$0xff]  ;;  %v1684_v32 = vld [vmem:[#allocation4 + $0xf0] sm:$0xff] }
  0x40   :  { %162 = vmatprep.subr.bf16.mxu0 %v1622_v12  ;;  %v121_v37 = vld [vmem:[#allocation8] sm:$0xf]  ;;  %v125_v45 = vld [vmem:[#allocation5 + $0x8] sm:$0xff] }
  0x41   :  { %202 = vmatpush1.bf16.msra.mxu1 %v1626_v13  ;;  %v124_v38 = vld [vmem:[#allocation5] sm:$0xff]  ;;  %v1724_v41 = vrot.slane %v121_v37, %v133_v36  ;;  %v1726_v43 = vrot.slane %v121_v37, %v137_v39  ;;  %v129_v48 = vunpack.c.h.bf16 %v125_v45  ;;  %v1730_v49 = vrot.slane %v121_v37, %v145_v44 }
  0x42   :  { %203 = vmatprep.subr.bf16.mxu1 %v1629_v14  ;;  %v126_v40 = vunpack.c.l.bf16 %v124_v38  ;;  %v127_v42 = vunpack.c.h.bf16 %v124_v38  ;;  %v128_v62 = vunpack.c.l.bf16 %v125_v45  ;;  %v1733_v63 = vrot.slane %v121_v37, %v141_v51 }
  0x43   :  { %163 = vmatpush1.bf16.msra.mxu0 %v1632_v15  ;;  %v154_v59 = vadd.f32 %v1730_v49, %v129_v48 }
  0x44   :  { %164 = vmatprep.subr.bf16.mxu0 %v1634_v16  ;;  %v151_v46 = vadd.f32 %v1724_v41, %v126_v40  ;;  %v152_v47 = vadd.f32 %v1726_v43, %v127_v42  ;;  %v153_v35 = vadd.f32 %v1733_v63, %v128_v62  ;;  %v269_v62 = vld [vmem:[#allocation5 + $0x18] sm:$0xff] }
  0x45   :  { %204 = vmatpush1.bf16.msra.mxu1 %v1638_v17 }
  0x46   :  { %205 = vmatprep.subr.bf16.mxu1 %v1641_v18 }
  0x47   :  { %165 = vmatpush1.bf16.msra.mxu0 %v1644_v19 }
  0x48   :  { %166 = vmatprep.subr.bf16.mxu0 %v1646_v20 }
  0x49   :  { %206 = vmatpush1.bf16.msra.mxu1 %v1650_v21 }
  0x4a   :  { %207 = vmatprep.subr.bf16.mxu1 %v1653_v22 }
  0x4b   :  { %167 = vmatpush1.bf16.msra.mxu0 %v1656_v23 }
  0x4c   :  { %168 = vmatprep.subr.bf16.mxu0 %v1658_v24 }
  0x4d   :  { %208 = vmatpush1.bf16.msra.mxu1 %v1662_v25 }
  0x4e   :  { %209 = vmatprep.subr.bf16.mxu1 %v1665_v26 }
  0x4f   :  { %169 = vmatpush1.bf16.msra.mxu0 %v1668_v27 }
  0x50   :  { %170 = vmatprep.subr.bf16.mxu0 %v1670_v28 }
  0x51   :  { %210 = vmatpush1.bf16.msra.mxu1 %v1674_v29 }
  0x52   :  { %211 = vmatprep.subr.bf16.mxu1 %v1677_v30 }
  0x53   :  { %171 = vmatpush1.bf16.msra.mxu0 %v1680_v31 }
  0x54   :  { %279 = vmatprep.subr.bf16.mxu0 %v1590_v0 }
  0x55   :  { %212 = vmatpush1.bf16.msra.mxu1 %v1684_v32 }
  0x56   :  { %189 = vmatmul.mubr.bf16.vlgmr.msra.gmra.mrb[0].mxu0 %v1527_v33  ;;  %320 = vmatprep.subr.bf16.mxu1 %v1599_v4 }
  0x57   :  { %280 = vmatpush1.bf16.msra.mxu0 %v1592_v1  ;;  %311 = vmatprep.mubr.bf16.mxu0 %v1526_v3 }
  0x58   :  { %230 = vmatmul.mubr.bf16.vlgmr.msra.gmra.mrb[0].mxu1 %v1527_v33  ;;  %281 = vmatprep.subr.bf16.mxu0 %v1594_v2 }
  0x59   :  { %321 = vmatpush1.bf16.msra.mxu1 %v1606_v6  ;;  %352 = vmatprep.mubr.bf16.mxu1 %v1526_v3 }
  0x5a   :  { %322 = vmatprep.subr.bf16.mxu1 %v1608_v7 }
  0x5b   :  { %282 = vmatpush1.bf16.msra.mxu0 %v1603_v5 }
  0x5c   :  { %283 = vmatprep.subr.bf16.mxu0 %v1610_v8 }
  0x5d   :  { %323 = vmatpush1.bf16.msra.mxu1 %v1614_v9 }
  0x5e   :  { %324 = vmatprep.subr.bf16.mxu1 %v1617_v10 }
  0x5f   :  { %284 = vmatpush1.bf16.msra.mxu0 %v1620_v11 }
  0x60   :  { %285 = vmatprep.subr.bf16.mxu0 %v1622_v12 }
  0x61   :  { %325 = vmatpush1.bf16.msra.mxu1 %v1626_v13 }
  0x62   :  { %326 = vmatprep.subr.bf16.mxu1 %v1629_v14 }
  0x63   :  { %286 = vmatpush1.bf16.msra.mxu0 %v1632_v15 }
  0x64   :  { %287 = vmatprep.subr.bf16.mxu0 %v1634_v16 }
  0x65   :  { %327 = vmatpush1.bf16.msra.mxu1 %v1638_v17 }
  0x66   :  { %328 = vmatprep.subr.bf16.mxu1 %v1641_v18 }
  0x67   :  { %288 = vmatpush1.bf16.msra.mxu0 %v1644_v19 }
  0x68   :  { %289 = vmatprep.subr.bf16.mxu0 %v1646_v20 }
  0x69   :  { %329 = vmatpush1.bf16.msra.mxu1 %v1650_v21 }
  0x6a   :  { %330 = vmatprep.subr.bf16.mxu1 %v1653_v22 }
  0x6b   :  { %290 = vmatpush1.bf16.msra.mxu0 %v1656_v23 }
  0x6c   :  { %291 = vmatprep.subr.bf16.mxu0 %v1658_v24 }
  0x6d   :  { %331 = vmatpush1.bf16.msra.mxu1 %v1662_v25 }
  0x6e   :  { %332 = vmatprep.subr.bf16.mxu1 %v1665_v26 }
  0x6f   :  { %292 = vmatpush1.bf16.msra.mxu0 %v1668_v27 }
  0x70   :  { %293 = vmatprep.subr.bf16.mxu0 %v1670_v28 }
  0x71   :  { %333 = vmatpush1.bf16.msra.mxu1 %v1674_v29 }
  0x72   :  { %334 = vmatprep.subr.bf16.mxu1 %v1677_v30 }
  0x73   :  { %294 = vmatpush1.bf16.msra.mxu0 %v1680_v31 }
  0x74   :  { %403 = vmatprep.subr.bf16.mxu0 %v1590_v0 }
  0x75   :  { %335 = vmatpush1.bf16.msra.mxu1 %v1684_v32 }
  0x76   :  { %444 = vmatprep.subr.bf16.mxu1 %v1599_v4 }
 0x129   :  { %v190_v50 = vpop.f32.mrb[0].mxu0 }
 0x12a   :  { %v238_v52 = vadd.f32 %v190_v50, %v151_v46  ;;  %v192_v53 = vpop.f32.mrb[1].mxu0 }
 0x12b   :  { %v239_v54 = vadd.f32 %v192_v53, %v152_v47  ;;  %v194_v55 = vpop.f32.mrb[2].mxu0  ;;  %v231_v56 = vpop.f32.mrb[0].mxu1 }
 0x12c   :  { %v1189_v57 = vmul.f32 -1.442695, %v238_v52  ;;  %v195_v58 = vpop.f32.mrb[3].mxu0  ;;  %v233_v60 = vpop.f32.mrb[1].mxu1  ;;  %v240_v39 = vadd.f32 %v231_v56, %v153_v35  ;;  %v273_v35 = vunpack.c.h.bf16 %v269_v62 }
 0x12d   :  { %v1190_v61 = vmul.f32 -1.442695, %v239_v54  ;;  %v235_v33 = vpop.f32.mrb[2].mxu1  ;;  %v241_v36 = vadd.f32 %v233_v60, %v154_v59  ;;  %v268_v58 = vld [vmem:[#allocation5 + $0x10] sm:$0xff] }
 0x12e   :  { %1233 = vpow2.f32 %v1189_v57  ;;  %v236_v34 = vpop.f32.mrb[3].mxu1  ;;  %v270_v59 = vunpack.c.l.bf16 %v268_v58  ;;  %v271_v60 = vunpack.c.h.bf16 %v268_v58 }
 0x12f   :  { %1235 = vpow2.f32 %v1190_v61  ;;  %v1191_v38 = vmul.f32 -1.442695, %v241_v36 }
 0x130   :  { %v274_v61 = vadd.f32 %v270_v59, %v1724_v41  ;;  %v275_v33 = vadd.f32 %v271_v60, %v1726_v43 }
 0x131   :  { %1237 = vpow2.f32 %v1191_v38 }
 0x132   :  { %1239 = vtanh.f32 %v240_v39 }
 0x138   :  { %v1234_v40 = vpop.eup %1233 }
 0x139   :  { %v1236_v42 = vpop.eup %1235  ;;  %v245_v44 = vadd.f32 1.0, %v1234_v40 }
 0x13a   :  { %v251_v46 = vadd.f32 1.0, %v1236_v42 }
 0x13b   :  { %1241 = vrcp.f32 %v245_v44  ;;  %v1238_v45 = vpop.eup %1237 }
 0x13c   :  { %1243 = vrcp.f32 %v251_v46  ;;  %v1240_v37 = vpop.eup %1239  ;;  %v258_v48 = vadd.f32 1.0, %v1238_v45 }
 0x13e   :  { %1245 = vrcp.f32 %v258_v48 }
 0x145   :  { %v1242_v47 = vpop.eup %1241 }
 0x146   :  { %v1244_v50 = vpop.eup %1243  ;;  %v262_v51 = vmul.f32 %v1242_v47, %v1240_v37 }
 0x147   :  { %v261_v52 = vmul.f32 0.0, %v1244_v50  ;;  %v277_v50 = vadd.f32 %v273_v35, %v1730_v49 }
 0x148   :  { %v1246_v54 = vpop.eup %1245 }
 0x149   :  { %v1736_v53 = vadd.f32 %v262_v51, %v261_v52  ;;  %v272_v51 = vunpack.c.l.bf16 %v269_v62 }
 0x14b   :  { %1247 = vtanh.f32 %v1736_v53 }
 0x155   :  { %v1248_v55 = vpop.eup %1247 }
 0x156   :  { %v265_v56 = vmul.f32 %v1248_v55, %v1246_v54  ;;  %v276_v54 = vadd.f32 %v272_v51, %v1733_v63 }
 0x158   :  { %266 = vst [vmem:[#allocation10] sm:$0xff] %v265_v56  ;;  %v278_v57 = vpack.c.bf16 %v265_v56, %v265_v56 }
 0x15a   :  { %312 = vmatmul.mubr.bf16.vlgmr.msra.gmra.mrb[4].mxu0 %v278_v57  ;;  %353 = vmatmul.mubr.bf16.vlgmr.msra.gmra.mrb[4].mxu1 %v278_v57 }
 0x15b   :  { %404 = vmatpush1.bf16.msra.mxu0 %v1592_v1  ;;  %445 = vmatpush1.bf16.msra.mxu1 %v1606_v6 }
 0x15c   :  { %405 = vmatprep.subr.bf16.mxu0 %v1594_v2  ;;  %446 = vmatprep.subr.bf16.mxu1 %v1608_v7 }
 0x15d   :  { %435 = vmatprep.mubr.bf16.mxu0 %v1526_v3  ;;  %476 = vmatprep.mubr.bf16.mxu1 %v1526_v3 }
 0x15f   :  { %406 = vmatpush1.bf16.msra.mxu0 %v1603_v5  ;;  %447 = vmatpush1.bf16.msra.mxu1 %v1614_v9 }
 0x160   :  { %407 = vmatprep.subr.bf16.mxu0 %v1610_v8  ;;  %448 = vmatprep.subr.bf16.mxu1 %v1617_v10 }
 0x163   :  { %408 = vmatpush1.bf16.msra.mxu0 %v1620_v11  ;;  %449 = vmatpush1.bf16.msra.mxu1 %v1626_v13 }
 0x164   :  { %409 = vmatprep.subr.bf16.mxu0 %v1622_v12  ;;  %450 = vmatprep.subr.bf16.mxu1 %v1629_v14 }
 0x167   :  { %410 = vmatpush1.bf16.msra.mxu0 %v1632_v15  ;;  %451 = vmatpush1.bf16.msra.mxu1 %v1638_v17 }
 0x168   :  { %411 = vmatprep.subr.bf16.mxu0 %v1634_v16  ;;  %452 = vmatprep.subr.bf16.mxu1 %v1641_v18 }
 0x16b   :  { %412 = vmatpush1.bf16.msra.mxu0 %v1644_v19  ;;  %453 = vmatpush1.bf16.msra.mxu1 %v1650_v21 }
 0x16c   :  { %413 = vmatprep.subr.bf16.mxu0 %v1646_v20  ;;  %454 = vmatprep.subr.bf16.mxu1 %v1653_v22 }
 0x16f   :  { %414 = vmatpush1.bf16.msra.mxu0 %v1656_v23  ;;  %455 = vmatpush1.bf16.msra.mxu1 %v1662_v25 }
 0x170   :  { %415 = vmatprep.subr.bf16.mxu0 %v1658_v24  ;;  %456 = vmatprep.subr.bf16.mxu1 %v1665_v26 }
 0x173   :  { %416 = vmatpush1.bf16.msra.mxu0 %v1668_v27  ;;  %457 = vmatpush1.bf16.msra.mxu1 %v1674_v29 }
 0x174   :  { %417 = vmatprep.subr.bf16.mxu0 %v1670_v28  ;;  %458 = vmatprep.subr.bf16.mxu1 %v1677_v30 }
 0x177   :  { %418 = vmatpush1.bf16.msra.mxu0 %v1680_v31  ;;  %459 = vmatpush1.bf16.msra.mxu1 %v1684_v32 }
 0x178   :  { %527 = vmatprep.subr.bf16.mxu0 %v1590_v0  ;;  %568 = vmatprep.subr.bf16.mxu1 %v1599_v4 }
 0x22d   :  { %v313_v34 = vpop.f32.mrb[4].mxu0  ;;  %v354_v36 = vpop.f32.mrb[4].mxu1 }
 0x22e   :  { %v361_v38 = vadd.f32 %v313_v34, %v274_v61  ;;  %v315_v39 = vpop.f32.mrb[5].mxu0  ;;  %v356_v40 = vpop.f32.mrb[5].mxu1  ;;  %v363_v56 = vadd.f32 %v354_v36, %v276_v54 }
 0x22f   :  { %v362_v42 = vadd.f32 %v315_v39, %v275_v33  ;;  %v317_v44 = vpop.f32.mrb[6].mxu0  ;;  %v358_v46 = vpop.f32.mrb[6].mxu1  ;;  %v364_v52 = vadd.f32 %v356_v40, %v277_v50 }
 0x230   :  { %v1192_v45 = vmul.f32 -1.442695, %v361_v38  ;;  %v318_v37 = vpop.f32.mrb[7].mxu0  ;;  %v359_v47 = vpop.f32.mrb[7].mxu1 }
 0x231   :  { %v1193_v48 = vmul.f32 -1.442695, %v362_v42  ;;  %v1194_v55 = vmul.f32 -1.442695, %v364_v52 }
 0x232   :  { %1249 = vpow2.f32 %v1192_v45 }
 0x233   :  { %1251 = vpow2.f32 %v1193_v48  ;;  %v393_v48 = vld [vmem:[#allocation5 + $0x28] sm:$0xff] }
 0x234   :  { %1253 = vpow2.f32 %v1194_v55  ;;  %v397_v54 = vunpack.c.h.bf16 %v393_v48 }
 0x235   :  { %1255 = vtanh.f32 %v363_v56 }
 0x23c   :  { %v1250_v57 = vpop.eup %1249 }
 0x23d   :  { %v1252_v58 = vpop.eup %1251  ;;  %v368_v59 = vadd.f32 1.0, %v1250_v57 }
 0x23e   :  { %v374_v60 = vadd.f32 1.0, %v1252_v58  ;;  %v1254_v61 = vpop.eup %1253 }
 0x23f   :  { %1257 = vrcp.f32 %v368_v59  ;;  %v1256_v33 = vpop.eup %1255  ;;  %v381_v62 = vadd.f32 1.0, %v1254_v61 }
 0x240   :  { %1259 = vrcp.f32 %v374_v60 }
 0x241   :  { %1261 = vrcp.f32 %v381_v62  ;;  %v396_v62 = vunpack.c.l.bf16 %v393_v48 }
 0x249   :  { %v1258_v34 = vpop.eup %1257 }
 0x24a   :  { %v1260_v35 = vpop.eup %1259  ;;  %v385_v38 = vmul.f32 %v1258_v34, %v1256_v33 }
 0x24b   :  { %v384_v39 = vmul.f32 %v1260_v35, %v1736_v53  ;;  %v1262_v36 = vpop.eup %1261  ;;  %v392_v53 = vld [vmem:[#allocation5 + $0x20] sm:$0xff] }
 0x24c   :  { %v394_v45 = vunpack.c.l.bf16 %v392_v53  ;;  %v395_v37 = vunpack.c.h.bf16 %v392_v53 }
 0x24d   :  { %v1778_v40 = vadd.f32 %v385_v38, %v384_v39  ;;  %v401_v38 = vadd.f32 %v397_v54, %v1730_v49 }
 0x24e   :  { %v398_v47 = vadd.f32 %v394_v45, %v1724_v41  ;;  %v399_v50 = vadd.f32 %v395_v37, %v1726_v43 }
 0x24f   :  { %1263 = vtanh.f32 %v1778_v40 }
 0x259   :  { %v1264_v42 = vpop.eup %1263 }
 0x25a   :  { %v388_v44 = vmul.f32 %v1264_v42, %v1262_v36  ;;  %v400_v36 = vadd.f32 %v396_v62, %v1733_v63 }
 0x25c   :  { %390 = vst [vmem:[#allocation10 + $0x8] sm:$0xff] %v388_v44  ;;  %v402_v46 = vpack.c.bf16 %v388_v44, %v388_v44 }
 0x25e   :  { %436 = vmatmul.mubr.bf16.vlgmr.msra.gmra.mrb[8].mxu0 %v402_v46  ;;  %477 = vmatmul.mubr.bf16.vlgmr.msra.gmra.mrb[8].mxu1 %v402_v46 }
 0x25f   :  { %528 = vmatpush1.bf16.msra.mxu0 %v1592_v1  ;;  %569 = vmatpush1.bf16.msra.mxu1 %v1606_v6 }
 0x260   :  { %529 = vmatprep.subr.bf16.mxu0 %v1594_v2  ;;  %570 = vmatprep.subr.bf16.mxu1 %v1608_v7 }
 0x261   :  { %559 = vmatprep.mubr.bf16.mxu0 %v1526_v3  ;;  %600 = vmatprep.mubr.bf16.mxu1 %v1526_v3 }
 0x263   :  { %530 = vmatpush1.bf16.msra.mxu0 %v1603_v5  ;;  %571 = vmatpush1.bf16.msra.mxu1 %v1614_v9 }
 0x264   :  { %531 = vmatprep.subr.bf16.mxu0 %v1610_v8  ;;  %572 = vmatprep.subr.bf16.mxu1 %v1617_v10 }
 0x267   :  { %532 = vmatpush1.bf16.msra.mxu0 %v1620_v11  ;;  %573 = vmatpush1.bf16.msra.mxu1 %v1626_v13 }
 0x268   :  { %533 = vmatprep.subr.bf16.mxu0 %v1622_v12  ;;  %574 = vmatprep.subr.bf16.mxu1 %v1629_v14 }
 0x26b   :  { %534 = vmatpush1.bf16.msra.mxu0 %v1632_v15  ;;  %575 = vmatpush1.bf16.msra.mxu1 %v1638_v17 }
 0x26c   :  { %535 = vmatprep.subr.bf16.mxu0 %v1634_v16  ;;  %576 = vmatprep.subr.bf16.mxu1 %v1641_v18 }
 0x26f   :  { %536 = vmatpush1.bf16.msra.mxu0 %v1644_v19  ;;  %577 = vmatpush1.bf16.msra.mxu1 %v1650_v21 }
 0x270   :  { %537 = vmatprep.subr.bf16.mxu0 %v1646_v20  ;;  %578 = vmatprep.subr.bf16.mxu1 %v1653_v22 }
 0x273   :  { %538 = vmatpush1.bf16.msra.mxu0 %v1656_v23  ;;  %579 = vmatpush1.bf16.msra.mxu1 %v1662_v25 }
 0x274   :  { %539 = vmatprep.subr.bf16.mxu0 %v1658_v24  ;;  %580 = vmatprep.subr.bf16.mxu1 %v1665_v26 }
 0x277   :  { %540 = vmatpush1.bf16.msra.mxu0 %v1668_v27  ;;  %581 = vmatpush1.bf16.msra.mxu1 %v1674_v29 }
 0x278   :  { %541 = vmatprep.subr.bf16.mxu0 %v1670_v28  ;;  %582 = vmatprep.subr.bf16.mxu1 %v1677_v30 }
 0x27b   :  { %542 = vmatpush1.bf16.msra.mxu0 %v1680_v31  ;;  %583 = vmatpush1.bf16.msra.mxu1 %v1684_v32 }
 0x27c   :  { %651 = vmatprep.subr.bf16.mxu0 %v1590_v0  ;;  %692 = vmatprep.subr.bf16.mxu1 %v1599_v4 }
 0x331   :  { %v437_v51 = vpop.f32.mrb[8].mxu0  ;;  %v478_v52 = vpop.f32.mrb[8].mxu1 }
 0x332   :  { %v485_v55 = vadd.f32 %v437_v51, %v398_v47  ;;  %v439_v56 = vpop.f32.mrb[9].mxu0  ;;  %v480_v57 = vpop.f32.mrb[9].mxu1  ;;  %v487_v44 = vadd.f32 %v478_v52, %v400_v36 }
 0x333   :  { %v486_v58 = vadd.f32 %v439_v56, %v399_v50  ;;  %v441_v59 = vpop.f32.mrb[10].mxu0  ;;  %v482_v60 = vpop.f32.mrb[10].mxu1  ;;  %v488_v39 = vadd.f32 %v480_v57, %v401_v38 }
 0x334   :  { %v1195_v61 = vmul.f32 -1.442695, %v485_v55  ;;  %v442_v33 = vpop.f32.mrb[11].mxu0  ;;  %v483_v34 = vpop.f32.mrb[11].mxu1 }
 0x335   :  { %v1196_v35 = vmul.f32 -1.442695, %v486_v58  ;;  %v1197_v42 = vmul.f32 -1.442695, %v488_v39 }
 0x336   :  { %1265 = vpow2.f32 %v1195_v61 }
 0x337   :  { %1267 = vpow2.f32 %v1196_v35  ;;  %v517_v35 = vld [vmem:[#allocation5 + $0x38] sm:$0xff] }
 0x338   :  { %1269 = vpow2.f32 %v1197_v42  ;;  %v521_v36 = vunpack.c.h.bf16 %v517_v35 }
 0x339   :  { %1271 = vtanh.f32 %v487_v44 }
 0x340   :  { %v1266_v46 = vpop.eup %1265 }
 0x341   :  { %v1268_v53 = vpop.eup %1267  ;;  %v492_v45 = vadd.f32 1.0, %v1266_v46 }
 0x342   :  { %v498_v37 = vadd.f32 1.0, %v1268_v53  ;;  %v1270_v47 = vpop.eup %1269 }
 0x343   :  { %1273 = vrcp.f32 %v492_v45  ;;  %v1272_v50 = vpop.eup %1271  ;;  %v505_v48 = vadd.f32 1.0, %v1270_v47 }
 0x344   :  { %1275 = vrcp.f32 %v498_v37 }
 0x345   :  { %1277 = vrcp.f32 %v505_v48  ;;  %v520_v48 = vunpack.c.l.bf16 %v517_v35 }
 0x34d   :  { %v1274_v51 = vpop.eup %1273 }
 0x34e   :  { %v1276_v54 = vpop.eup %1275  ;;  %v509_v55 = vmul.f32 %v1274_v51, %v1272_v50 }
 0x34f   :  { %v508_v56 = vmul.f32 %v1276_v54, %v1778_v40  ;;  %v1278_v52 = vpop.eup %1277  ;;  %v516_v40 = vld [vmem:[#allocation5 + $0x30] sm:$0xff] }
 0x350   :  { %v518_v61 = vunpack.c.l.bf16 %v516_v40  ;;  %v519_v33 = vunpack.c.h.bf16 %v516_v40 }
 0x351   :  { %v1820_v57 = vadd.f32 %v509_v55, %v508_v56  ;;  %v525_v55 = vadd.f32 %v521_v36, %v1730_v49 }
 0x352   :  { %v522_v34 = vadd.f32 %v518_v61, %v1724_v41  ;;  %v523_v38 = vadd.f32 %v519_v33, %v1726_v43 }
 0x353   :  { %1279 = vtanh.f32 %v1820_v57 }
 0x35d   :  { %v1280_v58 = vpop.eup %1279 }
 0x35e   :  { %v512_v59 = vmul.f32 %v1280_v58, %v1278_v52  ;;  %v524_v52 = vadd.f32 %v520_v48, %v1733_v63 }
 0x360   :  { %514 = vst [vmem:[#allocation10 + $0x10] sm:$0xff] %v512_v59  ;;  %v526_v60 = vpack.c.bf16 %v512_v59, %v512_v59 }
 0x362   :  { %560 = vmatmul.mubr.bf16.vlgmr.msra.gmra.mrb[12].mxu0 %v526_v60  ;;  %601 = vmatmul.mubr.bf16.vlgmr.msra.gmra.mrb[12].mxu1 %v526_v60 }
 0x363   :  { %652 = vmatpush1.bf16.msra.mxu0 %v1592_v1  ;;  %693 = vmatpush1.bf16.msra.mxu1 %v1606_v6 }
 0x364   :  { %653 = vmatprep.subr.bf16.mxu0 %v1594_v2  ;;  %694 = vmatprep.subr.bf16.mxu1 %v1608_v7 }
 0x365   :  { %683 = vmatprep.mubr.bf16.mxu0 %v1526_v3  ;;  %724 = vmatprep.mubr.bf16.mxu1 %v1526_v3 }
 0x367   :  { %654 = vmatpush1.bf16.msra.mxu0 %v1603_v5  ;;  %695 = vmatpush1.bf16.msra.mxu1 %v1614_v9 }
 0x368   :  { %655 = vmatprep.subr.bf16.mxu0 %v1610_v8  ;;  %696 = vmatprep.subr.bf16.mxu1 %v1617_v10 }
 0x36b   :  { %656 = vmatpush1.bf16.msra.mxu0 %v1620_v11  ;;  %697 = vmatpush1.bf16.msra.mxu1 %v1626_v13 }
 0x36c   :  { %657 = vmatprep.subr.bf16.mxu0 %v1622_v12  ;;  %698 = vmatprep.subr.bf16.mxu1 %v1629_v14 }
 0x36f   :  { %658 = vmatpush1.bf16.msra.mxu0 %v1632_v15  ;;  %699 = vmatpush1.bf16.msra.mxu1 %v1638_v17 }
 0x370   :  { %659 = vmatprep.subr.bf16.mxu0 %v1634_v16  ;;  %700 = vmatprep.subr.bf16.mxu1 %v1641_v18 }
 0x373   :  { %660 = vmatpush1.bf16.msra.mxu0 %v1644_v19  ;;  %701 = vmatpush1.bf16.msra.mxu1 %v1650_v21 }
 0x374   :  { %661 = vmatprep.subr.bf16.mxu0 %v1646_v20  ;;  %702 = vmatprep.subr.bf16.mxu1 %v1653_v22 }
 0x377   :  { %662 = vmatpush1.bf16.msra.mxu0 %v1656_v23  ;;  %703 = vmatpush1.bf16.msra.mxu1 %v1662_v25 }
 0x378   :  { %663 = vmatprep.subr.bf16.mxu0 %v1658_v24  ;;  %704 = vmatprep.subr.bf16.mxu1 %v1665_v26 }
 0x37b   :  { %664 = vmatpush1.bf16.msra.mxu0 %v1668_v27  ;;  %705 = vmatpush1.bf16.msra.mxu1 %v1674_v29 }
 0x37c   :  { %665 = vmatprep.subr.bf16.mxu0 %v1670_v28  ;;  %706 = vmatprep.subr.bf16.mxu1 %v1677_v30 }
 0x37f   :  { %666 = vmatpush1.bf16.msra.mxu0 %v1680_v31  ;;  %707 = vmatpush1.bf16.msra.mxu1 %v1684_v32 }
 0x380   :  { %775 = vmatprep.subr.bf16.mxu0 %v1590_v0  ;;  %816 = vmatprep.subr.bf16.mxu1 %v1599_v4 }
 0x435   :  { %v561_v62 = vpop.f32.mrb[12].mxu0  ;;  %v602_v39 = vpop.f32.mrb[12].mxu1 }
 0x436   :  { %v609_v42 = vadd.f32 %v561_v62, %v522_v34  ;;  %v563_v44 = vpop.f32.mrb[13].mxu0  ;;  %v604_v46 = vpop.f32.mrb[13].mxu1  ;;  %v611_v59 = vadd.f32 %v602_v39, %v524_v52 }
 0x437   :  { %v610_v53 = vadd.f32 %v563_v44, %v523_v38  ;;  %v565_v45 = vpop.f32.mrb[14].mxu0  ;;  %v606_v37 = vpop.f32.mrb[14].mxu1  ;;  %v612_v56 = vadd.f32 %v604_v46, %v525_v55 }
 0x438   :  { %v1198_v47 = vmul.f32 -1.442695, %v609_v42  ;;  %v566_v50 = vpop.f32.mrb[15].mxu0  ;;  %v607_v51 = vpop.f32.mrb[15].mxu1 }
 0x439   :  { %v1199_v54 = vmul.f32 -1.442695, %v610_v53  ;;  %v1200_v58 = vmul.f32 -1.442695, %v612_v56  ;;  %v641_v50 = vld [vmem:[#allocation5 + $0x48] sm:$0xff] }
 0x43a   :  { %1281 = vpow2.f32 %v1198_v47  ;;  %v645_v48 = vunpack.c.h.bf16 %v641_v50 }
 0x43b   :  { %1283 = vpow2.f32 %v1199_v54 }
 0x43c   :  { %1285 = vpow2.f32 %v1200_v58 }
 0x43d   :  { %1287 = vtanh.f32 %v611_v59 }
 0x444   :  { %v1282_v60 = vpop.eup %1281 }
 0x445   :  { %v1284_v40 = vpop.eup %1283  ;;  %v616_v61 = vadd.f32 1.0, %v1282_v60 }
 0x446   :  { %v622_v33 = vadd.f32 1.0, %v1284_v40  ;;  %v1286_v34 = vpop.eup %1285 }
 0x447   :  { %1289 = vrcp.f32 %v616_v61  ;;  %v1288_v38 = vpop.eup %1287  ;;  %v629_v35 = vadd.f32 1.0, %v1286_v34  ;;  %v649_v34 = vadd.f32 %v645_v48, %v1730_v49 }
 0x448   :  { %1291 = vrcp.f32 %v622_v33 }
 0x449   :  { %1293 = vrcp.f32 %v629_v35 }
 0x451   :  { %v1290_v62 = vpop.eup %1289 }
 0x452   :  { %v1292_v36 = vpop.eup %1291  ;;  %v633_v42 = vmul.f32 %v1290_v62, %v1288_v38  ;;  %v644_v38 = vunpack.c.l.bf16 %v641_v50 }
 0x453   :  { %v632_v44 = vmul.f32 %v1292_v36, %v1820_v57  ;;  %v1294_v39 = vpop.eup %1293 }
 0x454   :  { %v648_v36 = vadd.f32 %v644_v38, %v1733_v63 }
 0x455   :  { %v1862_v46 = vadd.f32 %v633_v42, %v632_v44 }
 0x457   :  { %1295 = vtanh.f32 %v1862_v46 }
 0x461   :  { %v1296_v53 = vpop.eup %1295 }
 0x462   :  { %v636_v45 = vmul.f32 %v1296_v53, %v1294_v39 }
 0x464   :  { %638 = vst [vmem:[#allocation10 + $0x18] sm:$0xff] %v636_v45  ;;  %v650_v37 = vpack.c.bf16 %v636_v45, %v636_v45 }
 0x466   :  { %684 = vmatmul.mubr.bf16.vlgmr.msra.gmra.mrb[16].mxu0 %v650_v37  ;;  %725 = vmatmul.mubr.bf16.vlgmr.msra.gmra.mrb[16].mxu1 %v650_v37 }
 0x467   :  { %776 = vmatpush1.bf16.msra.mxu0 %v1592_v1  ;;  %817 = vmatpush1.bf16.msra.mxu1 %v1606_v6  ;;  %v640_v1 = vld [vmem:[#allocation5 + $0x40] sm:$0xff] }
 0x468   :  { %777 = vmatprep.subr.bf16.mxu0 %v1594_v2  ;;  %818 = vmatprep.subr.bf16.mxu1 %v1608_v7  ;;  %v642_v2 = vunpack.c.l.bf16 %v640_v1  ;;  %v643_v57 = vunpack.c.h.bf16 %v640_v1 }
 0x469   :  { %807 = vmatprep.mubr.bf16.mxu0 %v1526_v3  ;;  %848 = vmatprep.mubr.bf16.mxu1 %v1526_v3 }
 0x46a   :  { %v646_v47 = vadd.f32 %v642_v2, %v1724_v41  ;;  %v647_v51 = vadd.f32 %v643_v57, %v1726_v43 }
 0x46b   :  { %778 = vmatpush1.bf16.msra.mxu0 %v1603_v5  ;;  %819 = vmatpush1.bf16.msra.mxu1 %v1614_v9 }
 0x46c   :  { %779 = vmatprep.subr.bf16.mxu0 %v1610_v8  ;;  %820 = vmatprep.subr.bf16.mxu1 %v1617_v10 }
 0x46f   :  { %780 = vmatpush1.bf16.msra.mxu0 %v1620_v11  ;;  %821 = vmatpush1.bf16.msra.mxu1 %v1626_v13 }
 0x470   :  { %781 = vmatprep.subr.bf16.mxu0 %v1622_v12  ;;  %822 = vmatprep.subr.bf16.mxu1 %v1629_v14 }
 0x473   :  { %782 = vmatpush1.bf16.msra.mxu0 %v1632_v15  ;;  %823 = vmatpush1.bf16.msra.mxu1 %v1638_v17 }
 0x474   :  { %783 = vmatprep.subr.bf16.mxu0 %v1634_v16  ;;  %824 = vmatprep.subr.bf16.mxu1 %v1641_v18 }
 0x477   :  { %784 = vmatpush1.bf16.msra.mxu0 %v1644_v19  ;;  %825 = vmatpush1.bf16.msra.mxu1 %v1650_v21 }
 0x478   :  { %785 = vmatprep.subr.bf16.mxu0 %v1646_v20  ;;  %826 = vmatprep.subr.bf16.mxu1 %v1653_v22 }
 0x47b   :  { %786 = vmatpush1.bf16.msra.mxu0 %v1656_v23  ;;  %827 = vmatpush1.bf16.msra.mxu1 %v1662_v25 }
 0x47c   :  { %787 = vmatprep.subr.bf16.mxu0 %v1658_v24  ;;  %828 = vmatprep.subr.bf16.mxu1 %v1665_v26 }
 0x47f   :  { %788 = vmatpush1.bf16.msra.mxu0 %v1668_v27  ;;  %829 = vmatpush1.bf16.msra.mxu1 %v1674_v29 }
 0x480   :  { %789 = vmatprep.subr.bf16.mxu0 %v1670_v28  ;;  %830 = vmatprep.subr.bf16.mxu1 %v1677_v30 }
 0x483   :  { %790 = vmatpush1.bf16.msra.mxu0 %v1680_v31  ;;  %831 = vmatpush1.bf16.msra.mxu1 %v1684_v32 }
 0x484   :  { %899 = vmatprep.subr.bf16.mxu0 %v1590_v0  ;;  %940 = vmatprep.subr.bf16.mxu1 %v1599_v4 }
 0x539   :  { %v685_v54 = vpop.f32.mrb[16].mxu0  ;;  %v726_v55 = vpop.f32.mrb[16].mxu1 }
 0x53a   :  { %v733_v56 = vadd.f32 %v685_v54, %v646_v47  ;;  %v687_v52 = vpop.f32.mrb[17].mxu0  ;;  %v728_v58 = vpop.f32.mrb[17].mxu1  ;;  %v735_v35 = vadd.f32 %v726_v55, %v648_v36 }
 0x53b   :  { %v734_v59 = vadd.f32 %v687_v52, %v647_v51  ;;  %v689_v60 = vpop.f32.mrb[18].mxu0  ;;  %v730_v40 = vpop.f32.mrb[18].mxu1  ;;  %v736_v62 = vadd.f32 %v728_v58, %v649_v34  ;;  %v1907_v58 = vld [vmem:[#allocation4] sm:$0xff] }
 0x53c   :  { %v1201_v0 = vmul.f32 -1.442695, %v733_v56  ;;  %v690_v61 = vpop.f32.mrb[19].mxu0  ;;  %v731_v4 = vpop.f32.mrb[19].mxu1 }
 0x53d   :  { %v1202_v33 = vmul.f32 -1.442695, %v734_v59  ;;  %v1203_v42 = vmul.f32 -1.442695, %v736_v62  ;;  %v1911_v59 = vld [vmem:[#allocation4 + $0x28] sm:$0xff] }
 0x53e   :  { %1297 = vpow2.f32 %v1201_v0 }
 0x53f   :  { %1299 = vpow2.f32 %v1202_v33 }
 0x540   :  { %1301 = vpow2.f32 %v1203_v42 }
 0x541   :  { %1303 = vtanh.f32 %v735_v35 }
 0x548   :  { %v1298_v44 = vpop.eup %1297 }
 0x549   :  { %v1300_v39 = vpop.eup %1299  ;;  %v740_v53 = vadd.f32 1.0, %v1298_v44 }
 0x54a   :  { %v746_v45 = vadd.f32 1.0, %v1300_v39  ;;  %v1302_v37 = vpop.eup %1301 }
 0x54b   :  { %1305 = vrcp.f32 %v740_v53  ;;  %v1304_v1 = vpop.eup %1303  ;;  %v753_v50 = vadd.f32 1.0, %v1302_v37  ;;  %v1365_v53 = vld [vmem:[#allocation4 + $0x10] sm:$0xff]  ;;  %v1367_v37 = vld [vmem:[#allocation4 + $0x20] sm:$0xff] }
 0x54c   :  { %1307 = vrcp.f32 %v746_v45  ;;  %v1366_v45 = vld [vmem:[#allocation4 + $0x38] sm:$0xff] }
 0x54d   :  { %1309 = vrcp.f32 %v753_v50  ;;  %v1372_v50 = vld [vmem:[#allocation4 + $0x50] sm:$0xff] }
 0x555   :  { %v1306_v2 = vpop.eup %1305 }
 0x556   :  { %v1308_v57 = vpop.eup %1307  ;;  %v757_v47 = vmul.f32 %v1306_v2, %v1304_v1  ;;  %v1368_v1 = vld [vmem:[#allocation4 + $0x30] sm:$0xff]  ;;  %v1369_v2 = vld [vmem:[#allocation4 + $0x48] sm:$0xff] }
 0x557   :  { %v756_v51 = vmul.f32 %v1308_v57, %v1862_v46  ;;  %v1310_v55 = vpop.eup %1309  ;;  %v1370_v57 = vld [vmem:[#allocation4 + $0x58] sm:$0xff] }
 0x559   :  { %v1904_v54 = vadd.f32 %v757_v47, %v756_v51  ;;  %v1371_v47 = vld [vmem:[#allocation4 + $0x40] sm:$0xff]  ;;  %v1373_v51 = vld [vmem:[#allocation4 + $0x68] sm:$0xff] }
 0x55b   :  { %1311 = vtanh.f32 %v1904_v54 }
 0x565   :  { %v1312_v48 = vpop.eup %1311 }
 0x566   :  { %v760_v56 = vmul.f32 %v1312_v48, %v1310_v55  ;;  %v1375_v55 = vld [vmem:[#allocation4 + $0x60] sm:$0xff]  ;;  %v1376_v48 = vld [vmem:[#allocation4 + $0x70] sm:$0xff] }
 0x568   :  { %762 = vst [vmem:[#allocation10 + $0x20] sm:$0xff] %v760_v56  ;;  %v774_v52 = vpack.c.bf16 %v760_v56, %v760_v56  ;;  %v1378_v56 = vld [vmem:[#allocation4 + $0x98] sm:$0xff] }
 0x56a   :  { %808 = vmatmul.mubr.bf16.vlgmr.msra.gmra.mrb[20].mxu0 %v774_v52  ;;  %849 = vmatmul.mubr.bf16.vlgmr.msra.gmra.mrb[20].mxu1 %v774_v52  ;;  %v1379_v52 = vld [vmem:[#allocation4 + $0x80] sm:$0xff] }
 0x56b   :  { %900 = vmatpush1.bf16.msra.mxu0 %v1907_v58  ;;  %941 = vmatpush1.bf16.msra.mxu1 %v1606_v6  ;;  %v1364_v6 = vld [vmem:[#allocation4 + $0x18] sm:$0xff] }
 0x56c   :  { %901 = vmatprep.subr.bf16.mxu0 %v1911_v59  ;;  %942 = vmatprep.subr.bf16.mxu1 %v1608_v7  ;;  %v764_v7 = vld [vmem:[#allocation5 + $0x50] sm:$0xff] }
 0x56d   :  { %931 = vmatprep.mubr.bf16.mxu0 %v1526_v3  ;;  %972 = vmatprep.mubr.bf16.mxu1 %v1526_v3 }
 0x56f   :  { %902 = vmatpush1.bf16.msra.mxu0 %v1603_v5  ;;  %943 = vmatpush1.bf16.msra.mxu1 %v1614_v9  ;;  %v1363_v5 = vld [vmem:[#allocation4 + $0x8] sm:$0xff]  ;;  %v767_v9 = vunpack.c.h.bf16 %v764_v7 }
 0x570   :  { %903 = vmatprep.subr.bf16.mxu0 %v1610_v8  ;;  %944 = vmatprep.subr.bf16.mxu1 %v1617_v10  ;;  %v766_v8 = vunpack.c.l.bf16 %v764_v7  ;;  %v1384_v7 = vld [vmem:[#allocation4 + $0xb0] sm:$0xff] }
 0x572   :  { %v770_v10 = vadd.f32 %v766_v8, %v1724_v41  ;;  %v1385_v8 = vld [vmem:[#allocation4 + $0xc8] sm:$0xff] }
 0x573   :  { %904 = vmatpush1.bf16.msra.mxu0 %v1620_v11  ;;  %945 = vmatpush1.bf16.msra.mxu1 %v1626_v13  ;;  %v765_v11 = vld [vmem:[#allocation5 + $0x58] sm:$0xff] }
 0x574   :  { %905 = vmatprep.subr.bf16.mxu0 %v1622_v12  ;;  %946 = vmatprep.subr.bf16.mxu1 %v1629_v14  ;;  %v771_v12 = vadd.f32 %v767_v9, %v1726_v43  ;;  %v1386_v9 = vld [vmem:[#allocation4 + $0xd8] sm:$0xff] }
 0x577   :  { %906 = vmatpush1.bf16.msra.mxu0 %v1632_v15  ;;  %947 = vmatpush1.bf16.msra.mxu1 %v1638_v17  ;;  %v769_v15 = vunpack.c.h.bf16 %v765_v11 }
 0x578   :  { %907 = vmatprep.subr.bf16.mxu0 %v1634_v16  ;;  %948 = vmatprep.subr.bf16.mxu1 %v1641_v18 }
 0x57b   :  { %908 = vmatpush1.bf16.msra.mxu0 %v1644_v19  ;;  %949 = vmatpush1.bf16.msra.mxu1 %v1650_v21 }
 0x57c   :  { %909 = vmatprep.subr.bf16.mxu0 %v1646_v20  ;;  %950 = vmatprep.subr.bf16.mxu1 %v1653_v22 }
 0x57f   :  { %910 = vmatpush1.bf16.msra.mxu0 %v1656_v23  ;;  %951 = vmatpush1.bf16.msra.mxu1 %v1662_v25 }
 0x580   :  { %911 = vmatprep.subr.bf16.mxu0 %v1658_v24  ;;  %952 = vmatprep.subr.bf16.mxu1 %v1665_v26  ;;  %v773_v26 = vadd.f32 %v769_v15, %v1730_v49  ;;  %v1392_v15 = vld [vmem:[#allocation4 + $0xf0] sm:$0xff] }
 0x583   :  { %912 = vmatpush1.bf16.msra.mxu0 %v1668_v27  ;;  %953 = vmatpush1.bf16.msra.mxu1 %v1674_v29  ;;  %v768_v27 = vunpack.c.l.bf16 %v765_v11  ;;  %v1388_v11 = vld [vmem:[#allocation4 + $0xd0] sm:$0xff] }
 0x584   :  { %913 = vmatprep.subr.bf16.mxu0 %v1670_v28  ;;  %954 = vmatprep.subr.bf16.mxu1 %v1677_v30 }
 0x585   :  { %v772_v29 = vadd.f32 %v768_v27, %v1733_v63 }
 0x587   :  { %914 = vmatpush1.bf16.msra.mxu0 %v1680_v31  ;;  %955 = vmatpush1.bf16.msra.mxu1 %v1684_v32 }
 0x588   :  { %1023 = vmatprep.subr.bf16.mxu0 %v1363_v5  ;;  %1064 = vmatprep.subr.bf16.mxu1 %v1364_v6  ;;  %v1382_v5 = vld [vmem:[#allocation4 + $0xb8] sm:$0xff]  ;;  %v1383_v6 = vld [vmem:[#allocation4 + $0xa0] sm:$0xff] }
 0x63d   :  { %v809_v13 = vpop.f32.mrb[20].mxu0  ;;  %v850_v14 = vpop.f32.mrb[20].mxu1 }
 0x63e   :  { %v857_v16 = vadd.f32 %v809_v13, %v770_v10  ;;  %v811_v17 = vpop.f32.mrb[21].mxu0  ;;  %v852_v18 = vpop.f32.mrb[21].mxu1  ;;  %v859_v31 = vadd.f32 %v850_v14, %v772_v29  ;;  %v1387_v10 = vld [vmem:[#allocation4 + $0xc0] sm:$0xff]  ;;  %v1390_v13 = vld [vmem:[#allocation4 + $0xf8] sm:$0xff] }
 0x63f   :  { %v858_v19 = vadd.f32 %v811_v17, %v771_v12  ;;  %v813_v20 = vpop.f32.mrb[22].mxu0  ;;  %v854_v21 = vpop.f32.mrb[22].mxu1  ;;  %v860_v28 = vadd.f32 %v852_v18, %v773_v26  ;;  %v1389_v12 = vld [vmem:[#allocation4 + $0xe8] sm:$0xff]  ;;  %v1391_v14 = vld [vmem:[#allocation4 + $0xe0] sm:$0xff] }
 0x640   :  { %v1204_v22 = vmul.f32 -1.442695, %v857_v16  ;;  %v814_v23 = vpop.f32.mrb[23].mxu0  ;;  %v855_v24 = vpop.f32.mrb[23].mxu1  ;;  %v888_v16 = vld [vmem:[#allocation5 + $0x60] sm:$0xff]  ;;  %v889_v20 = vld [vmem:[#allocation5 + $0x68] sm:$0xff] }
 0x641   :  { %v1205_v25 = vmul.f32 -1.442695, %v858_v19  ;;  %v1206_v30 = vmul.f32 -1.442695, %v860_v28  ;;  %v890_v17 = vunpack.c.l.bf16 %v888_v16  ;;  %v891_v18 = vunpack.c.h.bf16 %v888_v16 }
 0x642   :  { %1313 = vpow2.f32 %v1204_v22  ;;  %v893_v24 = vunpack.c.h.bf16 %v889_v20 }
 0x643   :  { %1315 = vpow2.f32 %v1205_v25  ;;  %v894_v19 = vadd.f32 %v890_v17, %v1724_v41  ;;  %v895_v21 = vadd.f32 %v891_v18, %v1726_v43 }
 0x644   :  { %1317 = vpow2.f32 %v1206_v30 }
 0x645   :  { %1319 = vtanh.f32 %v859_v31 }
 0x64c   :  { %v1314_v32 = vpop.eup %1313 }
 0x64d   :  { %v1316_v46 = vpop.eup %1315  ;;  %v864_v60 = vadd.f32 1.0, %v1314_v32 }
 0x64e   :  { %v870_v40 = vadd.f32 1.0, %v1316_v46  ;;  %v1318_v0 = vpop.eup %1317 }
 0x64f   :  { %1321 = vrcp.f32 %v864_v60  ;;  %v1320_v61 = vpop.eup %1319  ;;  %v877_v38 = vadd.f32 1.0, %v1318_v0  ;;  %v892_v0 = vunpack.c.l.bf16 %v889_v20 }
 0x650   :  { %1323 = vrcp.f32 %v870_v40  ;;  %v897_v40 = vadd.f32 %v893_v24, %v1730_v49 }
 0x651   :  { %1325 = vrcp.f32 %v877_v38 }
 0x659   :  { %v1322_v4 = vpop.eup %1321 }
 0x65a   :  { %v1324_v33 = vpop.eup %1323  ;;  %v881_v34 = vmul.f32 %v1322_v4, %v1320_v61  ;;  %v896_v4 = vadd.f32 %v892_v0, %v1733_v63 }
 0x65b   :  { %v880_v62 = vmul.f32 %v1324_v33, %v1904_v54  ;;  %v1326_v42 = vpop.eup %1325  ;;  %v1374_v54 = vld [vmem:[#allocation4 + $0x78] sm:$0xff] }
 0x65d   :  { %v1948_v36 = vadd.f32 %v881_v34, %v880_v62 }
 0x65f   :  { %1327 = vtanh.f32 %v1948_v36 }
 0x669   :  { %v1328_v35 = vpop.eup %1327 }
 0x66a   :  { %v884_v44 = vmul.f32 %v1328_v35, %v1326_v42 }
 0x66c   :  { %886 = vst [vmem:[#allocation10 + $0x28] sm:$0xff] %v884_v44  ;;  %v898_v39 = vpack.c.bf16 %v884_v44, %v884_v44 }
 0x66e   :  { %932 = vmatmul.mubr.bf16.vlgmr.msra.gmra.mrb[24].mxu0 %v898_v39  ;;  %973 = vmatmul.mubr.bf16.vlgmr.msra.gmra.mrb[24].mxu1 %v898_v39 }
 0x66f   :  { %1024 = vmatpush1.bf16.msra.mxu0 %v1907_v58  ;;  %1065 = vmatpush1.bf16.msra.mxu1 %v1365_v53  ;;  %v1380_v58 = vld [vmem:[#allocation4 + $0x90] sm:$0xff] }
 0x670   :  { %1025 = vmatprep.subr.bf16.mxu0 %v1911_v59  ;;  %1066 = vmatprep.subr.bf16.mxu1 %v1366_v45  ;;  %v1381_v59 = vld [vmem:[#allocation4 + $0xa8] sm:$0xff] }
 0x671   :  { %1055 = vmatprep.mubr.bf16.mxu0 %v1526_v3  ;;  %1096 = vmatprep.mubr.bf16.mxu1 %v1526_v3  ;;  %v1377_v3 = vld [vmem:[#allocation4 + $0x88] sm:$0xff] }
 0x673   :  { %1026 = vmatpush1.bf16.msra.mxu0 %v1367_v37  ;;  %1067 = vmatpush1.bf16.msra.mxu1 %v1368_v1 }
 0x674   :  { %1027 = vmatprep.subr.bf16.mxu0 %v1369_v2  ;;  %1068 = vmatprep.subr.bf16.mxu1 %v1370_v57 }
 0x677   :  { %1028 = vmatpush1.bf16.msra.mxu0 %v1371_v47  ;;  %1069 = vmatpush1.bf16.msra.mxu1 %v1372_v50 }
 0x678   :  { %1029 = vmatprep.subr.bf16.mxu0 %v1373_v51  ;;  %1070 = vmatprep.subr.bf16.mxu1 %v1374_v54 }
 0x67b   :  { %1030 = vmatpush1.bf16.msra.mxu0 %v1375_v55  ;;  %1071 = vmatpush1.bf16.msra.mxu1 %v1376_v48  ;;  %v1012_v55 = vld [vmem:[#allocation5 + $0x70] sm:$0xff] }
 0x67c   :  { %1031 = vmatprep.subr.bf16.mxu0 %v1377_v3  ;;  %1072 = vmatprep.subr.bf16.mxu1 %v1378_v56  ;;  %v1014_v48 = vunpack.c.l.bf16 %v1012_v55  ;;  %v1015_v3 = vunpack.c.h.bf16 %v1012_v55 }
 0x67e   :  { %v1018_v56 = vadd.f32 %v1014_v48, %v1724_v41 }
 0x67f   :  { %1032 = vmatpush1.bf16.msra.mxu0 %v1379_v52  ;;  %1073 = vmatpush1.bf16.msra.mxu1 %v1380_v58  ;;  %v1013_v52 = vld [vmem:[#allocation5 + $0x78] sm:$0xff]  ;;  %v1019_v58 = vadd.f32 %v1015_v3, %v1726_v43 }
 0x680   :  { %1033 = vmatprep.subr.bf16.mxu0 %v1381_v59  ;;  %1074 = vmatprep.subr.bf16.mxu1 %v1382_v5  ;;  %v1017_v5 = vunpack.c.h.bf16 %v1013_v52  ;;  %v1016_v41 = vunpack.c.l.bf16 %v1013_v52 }
 0x682   :  { %v1021_v16 = vadd.f32 %v1017_v5, %v1730_v49  ;;  %v1020_v43 = vadd.f32 %v1016_v41, %v1733_v63 }
 0x683   :  { %1034 = vmatpush1.bf16.msra.mxu0 %v1383_v6  ;;  %1075 = vmatpush1.bf16.msra.mxu1 %v1384_v7 }
 0x684   :  { %1035 = vmatprep.subr.bf16.mxu0 %v1385_v8  ;;  %1076 = vmatprep.subr.bf16.mxu1 %v1386_v9 }
 0x687   :  { %1036 = vmatpush1.bf16.msra.mxu0 %v1387_v10  ;;  %1077 = vmatpush1.bf16.msra.mxu1 %v1388_v11 }
 0x688   :  { %1037 = vmatprep.subr.bf16.mxu0 %v1389_v12  ;;  %1078 = vmatprep.subr.bf16.mxu1 %v1390_v13 }
 0x68b   :  { %1038 = vmatpush1.bf16.msra.mxu0 %v1391_v14  ;;  %1079 = vmatpush1.bf16.msra.mxu1 %v1392_v15 }
 0x741   :  { %v933_v22 = vpop.f32.mrb[24].mxu0  ;;  %v974_v23 = vpop.f32.mrb[24].mxu1 }
 0x742   :  { %v981_v25 = vadd.f32 %v933_v22, %v894_v19  ;;  %v935_v26 = vpop.f32.mrb[25].mxu0  ;;  %v976_v27 = vpop.f32.mrb[25].mxu1  ;;  %v983_v34 = vadd.f32 %v974_v23, %v896_v4 }
 0x743   :  { %v982_v28 = vadd.f32 %v935_v26, %v895_v21  ;;  %v937_v29 = vpop.f32.mrb[26].mxu0  ;;  %v978_v30 = vpop.f32.mrb[26].mxu1  ;;  %v984_v61 = vadd.f32 %v976_v27, %v897_v40 }
 0x744   :  { %v1207_v31 = vmul.f32 -1.442695, %v981_v25  ;;  %v938_v32 = vpop.f32.mrb[27].mxu0  ;;  %v979_v46 = vpop.f32.mrb[27].mxu1 }
 0x745   :  { %v1208_v60 = vmul.f32 -1.442695, %v982_v28  ;;  %v1209_v33 = vmul.f32 -1.442695, %v984_v61 }
 0x746   :  { %1329 = vpow2.f32 %v1207_v31 }
 0x747   :  { %1331 = vpow2.f32 %v1208_v60 }
 0x748   :  { %1333 = vpow2.f32 %v1209_v33 }
 0x749   :  { %1335 = vtanh.f32 %v983_v34 }
 0x750   :  { %v1330_v38 = vpop.eup %1329 }
 0x751   :  { %v1332_v62 = vpop.eup %1331  ;;  %v988_v42 = vadd.f32 1.0, %v1330_v38 }
 0x752   :  { %v994_v35 = vadd.f32 1.0, %v1332_v62  ;;  %v1334_v44 = vpop.eup %1333 }
 0x753   :  { %1337 = vrcp.f32 %v988_v42  ;;  %v1336_v39 = vpop.eup %1335  ;;  %v1001_v1 = vadd.f32 1.0, %v1334_v44 }
 0x754   :  { %1339 = vrcp.f32 %v994_v35 }
 0x755   :  { %1341 = vrcp.f32 %v1001_v1 }
 0x75d   :  { %v1338_v53 = vpop.eup %1337 }
 0x75e   :  { %v1340_v45 = vpop.eup %1339  ;;  %v1005_v37 = vmul.f32 %v1338_v53, %v1336_v39 }
 0x75f   :  { %v1004_v2 = vmul.f32 %v1340_v45, %v1948_v36  ;;  %v1342_v47 = vpop.eup %1341 }
 0x761   :  { %v1006_v57 = vadd.f32 %v1005_v37, %v1004_v2 }
 0x763   :  { %1343 = vtanh.f32 %v1006_v57 }
 0x76d   :  { %v1344_v50 = vpop.eup %1343 }
 0x76e   :  { %v1008_v51 = vmul.f32 %v1344_v50, %v1342_v47 }
 0x770   :  { %1010 = vst [vmem:[#allocation10 + $0x30] sm:$0xff] %v1008_v51  ;;  %v1022_v54 = vpack.c.bf16 %v1008_v51, %v1008_v51 }
 0x772   :  { %1056 = vmatmul.mubr.bf16.vlgmr.msra.gmra.mrb[28].mxu0 %v1022_v54  ;;  %1097 = vmatmul.mubr.bf16.vlgmr.msra.gmra.mrb[28].mxu1 %v1022_v54 }
 0x845   :  { %v1057_v59 = vpop.f32.mrb[28].mxu0  ;;  %v1098_v36 = vpop.f32.mrb[28].mxu1 }
 0x846   :  { %v1105_v6 = vadd.f32 %v1057_v59, %v1018_v56  ;;  %v1059_v7 = vpop.f32.mrb[29].mxu0  ;;  %v1100_v8 = vpop.f32.mrb[29].mxu1  ;;  %v1107_v19 = vadd.f32 %v1098_v36, %v1020_v43 }
 0x847   :  { %v1106_v9 = vadd.f32 %v1059_v7, %v1019_v58  ;;  %v1061_v10 = vpop.f32.mrb[30].mxu0  ;;  %v1102_v11 = vpop.f32.mrb[30].mxu1  ;;  %v1108_v17 = vadd.f32 %v1100_v8, %v1021_v16 }
 0x848   :  { %v1210_v12 = vmul.f32 -1.442695, %v1105_v6  ;;  %v1062_v13 = vpop.f32.mrb[31].mxu0  ;;  %v1103_v14 = vpop.f32.mrb[31].mxu1 }
 0x849   :  { %v1211_v15 = vmul.f32 -1.442695, %v1106_v9  ;;  %v1212_v18 = vmul.f32 -1.442695, %v1108_v17 }
 0x84a   :  { %1345 = vpow2.f32 %v1210_v12 }
 0x84b   :  { %1347 = vpow2.f32 %v1211_v15 }
 0x84c   :  { %1349 = vpow2.f32 %v1212_v18 }
 0x84d   :  { %1351 = vtanh.f32 %v1107_v19 }
 0x854   :  { %v1346_v20 = vpop.eup %1345 }
 0x855   :  { %v1348_v21 = vpop.eup %1347  ;;  %v1112_v22 = vadd.f32 1.0, %v1346_v20 }
 0x856   :  { %v1118_v23 = vadd.f32 1.0, %v1348_v21  ;;  %v1350_v24 = vpop.eup %1349 }
 0x857   :  { %1353 = vrcp.f32 %v1112_v22  ;;  %v1352_v25 = vpop.eup %1351  ;;  %v1125_v28 = vadd.f32 1.0, %v1350_v24 }
 0x858   :  { %1355 = vrcp.f32 %v1118_v23 }
 0x859   :  { %1357 = vrcp.f32 %v1125_v28 }
 0x861   :  { %v1354_v26 = vpop.eup %1353 }
 0x862   :  { %v1356_v49 = vpop.eup %1355  ;;  %v1129_v27 = vmul.f32 %v1354_v26, %v1352_v25 }
 0x863   :  { %v1128_v29 = vmul.f32 %v1356_v49, %v1006_v57  ;;  %v1358_v63 = vpop.eup %1357 }
 0x865   :  { %v1130_v30 = vadd.f32 %v1129_v27, %v1128_v29 }
 0x867   :  { %1359 = vtanh.f32 %v1130_v30  ;;  %1141 = vst [vmem:[#allocation13] sm:$0xff] %v1130_v30 }
 0x871   :  { %v1360_v31 = vpop.eup %1359 }
 0x872   :  { %v1132_v32 = vmul.f32 %v1360_v31, %v1358_v63 }
 0x874   :  { %1134 = vst [vmem:[#allocation10 + $0x38] sm:$0xff] %v1132_v32  ;;  %1140 = vst [vmem:[#allocation11] sm:$0xff] %v1132_v32 }
 0x875   :  { %1448 = shalt.err (!%p1445_p6)
}
 0x876   :  { %s1449_s15 = scalar_lea.hbm %s2018_s4, 128 }
 0x877   :  { %p1450_p7 = scmp.ne.s32.totalorder %s2018_s4, %s1449_s15  ;;  %p1453_p8 = scmp.lt.u32.totalorder %s1449_s15, %s2018_s4 }
 0x879   :  { %p1455_p9 = pnand %p1453_p8, %p1450_p7 }
 0x87b   :  { %1458 = shalt.err (!%p1455_p9)
}
 0x87c   :  { %1163 = dma.vmem_to_hbm [thread:$0]  %s1161_s7, 128, %s2018_s4, [#allocation12]  }
 0x87d   :  { %s1459_s21 = scalar_lea.vmem %s1964_s9, 1024  ;;  %p1464_p11 = scmp.lt.s32.totalorder %s1964_s9, %s1964_s9 }
 0x87e   :  { %p1460_p10 = scmp.ne.s32.totalorder %s1964_s9, %s1459_s21  ;;  %p1465_p12 = scmp.lt.s32.totalorder %s1459_s21, %s1459_s21 }
 0x880   :  { %p1466_p13 = por %p1465_p12, %p1464_p11 }
 0x882   :  { %p1467_p0 = pnand %p1466_p13, %p1460_p10 }
 0x884   :  { %1470 = shalt.err (!%p1467_p0)
}
 0x885   :  { %s1471_s24 = scalar_lea.hbm %s2017_s3, 1024 }
 0x886   :  { %p1472_p1 = scmp.ne.s32.totalorder %s2017_s3, %s1471_s24  ;;  %p1475_p2 = scmp.lt.u32.totalorder %s1471_s24, %s2017_s3 }
 0x888   :  { %p1477_p3 = pnand %p1475_p2, %p1472_p1 }
 0x88a   :  { %1480 = shalt.err (!%p1477_p3)
}
 0x88b   :  { %s1531_s4 = smov 128   ;;  %s1532_s28 = smov 8  }
 0x88c   :  { %1153 = dma.vmem_to_hbm [thread:$0]  %s1964_s9, 1024, %s2017_s3, [#allocation7], %s1531_s4, %s1531_s4, %s1532_s28  }
 0x88d   :  { %s1481_s6 = scalar_lea.vmem %s1966_s11, 128  ;;  %p1486_p5 = scmp.lt.s32.totalorder %s1966_s11, %s1966_s11 }
 0x88e   :  { %p1482_p4 = scmp.ne.s32.totalorder %s1966_s11, %s1481_s6  ;;  %p1487_p6 = scmp.lt.s32.totalorder %s1481_s6, %s1481_s6 }
 0x890   :  { %p1488_p7 = por %p1487_p6, %p1486_p5 }
 0x892   :  { %p1489_p8 = pnand %p1488_p7, %p1482_p4 }
 0x894   :  { %1492 = shalt.err (!%p1489_p8)
}
 0x895   :  { %s1493_s8 = scalar_lea.hbm %s2019_s5, 128 }
 0x896   :  { %p1494_p9 = scmp.ne.s32.totalorder %s2019_s5, %s1493_s8  ;;  %p1497_p10 = scmp.lt.u32.totalorder %s1493_s8, %s2019_s5 }
 0x898   :  { %p1499_p11 = pnand %p1497_p10, %p1494_p9 }
 0x89a   :  { %1502 = shalt.err (!%p1499_p11)
}
 0x89b   :  { %1173 = dma.vmem_to_hbm [thread:$0]  %s1966_s11, 128, %s2019_s5, [#allocation12]  }
 0x89c   :  { %1509 = dma.done.wait [#allocation7], 1024  }
 0x89d   :  { %1510 = vsyncadd [#allocation7], 4294966272 }
 0x89e   :  { %1511 = dma.done.wait [#allocation12], 256  }
 0x89f   :  { %1512 = vsyncadd [#allocation12], 4294967040 }
 0x8a0   :  { %1183 = vsyncpa [#allocation6], 1 }
 0x8a1   :  { %1184 = vsyncpa [#allocation9], 1 }
 0x8a2   :  { %1185 = vsyncpa [#allocation7], 1 }
 0x8a3   :  { %1186 = vsyncpa [#allocation12], 1 }

</bundles_post_ra>
